<compile_context>
chip_gen: v6e
topology: v6e:2x2x1
jax: 0.10.0
libtpu: 0.0.40
codegen_flags: <defaults>
</compile_context>

<pallas_src>
import functools

import jax
import jax.numpy as jnp
from jax import lax
from jax.experimental import pallas as pl
from jax.experimental.pallas import tpu as pltpu


def attn_kernel(x_ref, gamma_ref, beta_ref, gmat_ref,
                wqkv_ref, bqkv_ref, wp_ref, bp_ref,
                o_ref,
                qT_scr, kT_scr, vT_scr,
                *, nt, s, c, cg, eps, kv_chunk, n_kv):
    """One batch element: in-kernel GroupNorm -> fused QKV -> per-time-slice
    (KV-chunked, online-softmax) SDPA -> output projection -> residual add.

    HBM-facing tensors stay channel-first (C, T*S) (lane-dense); attention
    operands are transposed once inside VMEM.
    """
    ts = nt * s
    x = x_ref[0]                                        # (C, TS) f32

    # ---- GroupNorm, stats fused in-kernel (no extra HBM pass over x) ----
    ch_sum = jnp.sum(x, axis=-1, keepdims=True)         # (C, 1)
    ch_sq = jnp.sum(x * x, axis=-1, keepdims=True)      # (C, 1)
    if cg == 1:                                         # one channel per group
        inv_n = 1.0 / float(ts)
        gmean = ch_sum * inv_n
        gmsq = ch_sq * inv_n
    else:                                               # general groups: tiny matvec
        gmean = jnp.dot(gmat_ref[...], ch_sum, preferred_element_type=jnp.float32)
        gmsq = jnp.dot(gmat_ref[...], ch_sq, preferred_element_type=jnp.float32)
    rstd = lax.rsqrt(gmsq - gmean * gmean + eps)        # biased var (as torch GN)
    scale = rstd * gamma_ref[...]                       # (C, 1)
    shift = beta_ref[...] - gmean * scale               # (C, 1)
    hb = (x * scale + shift).astype(jnp.bfloat16)       # (C, TS) bf16

    # ---- fused QKV projection: (3C, C) @ (C, TS); N = TS is lane-dense ----
    qkv = jnp.dot(wqkv_ref[...], hb,
                  preferred_element_type=jnp.float32) + bqkv_ref[...]   # (3C, TS) f32
    # Q/K/V are sublane slices (free).  Transposed once (f32 transpose, safe
    # lowering), cast to bf16 and parked in scratch so the f32 qkv value dies.
    qT_scr[...] = jnp.transpose(qkv[0 * c:1 * c, :]).astype(jnp.bfloat16)  # (TS, C)
    kT_scr[...] = jnp.transpose(qkv[1 * c:2 * c, :]).astype(jnp.bfloat16)  # (TS, C)
    vT_scr[...] = jnp.transpose(qkv[2 * c:3 * c, :]).astype(jnp.bfloat16)  # (TS, C)

    sm_scale = 1.0 / (float(c) ** 0.5)                  # PyTorch SDPA default scale

    # ---- attention per time slice (attention mixes only within a slice) ----
    # TODO(synk): nt is small for this module; for large nt move this static
    # unroll to a fori_loop / extra grid axis to bound live ranges.
    for ti in range(nt):
        row0 = ti * s
        q_t = qT_scr[row0:row0 + s, :]                  # (S, C) bf16

        if n_kv == 1:
            k_t = kT_scr[row0:row0 + s, :]              # (S, C) bf16
            v_t = vT_scr[row0:row0 + s, :]              # (S, C) bf16
            sc = lax.dot_general(q_t, k_t, (((1,), (1,)), ((), ())),
                                 preferred_element_type=jnp.float32) * sm_scale
            m_i = jnp.max(sc, axis=-1, keepdims=True)
            # TODO(synk): bf16 exp (~2x EUP rate) is the next lever on v6e/v7x at
            # production S (EUP-bound); kept f32 for accuracy / v5e portability.
            p = jnp.exp(sc - m_i)
            l_i = jnp.sum(p, axis=-1, keepdims=True)
            acc = jnp.dot(p.astype(jnp.bfloat16), v_t,
                          preferred_element_type=jnp.float32)            # (S, C) f32
        else:
            # Flash-style online softmax over KV chunks: only an (S, kv_chunk)
            # score tile is ever live, never (S, S) / (T, S, S).
            def kv_step(j, carry, _row0=row0, _q=q_t):
                m_p, l_p, acc_p = carry
                off = pl.multiple_of(_row0 + j * kv_chunk, kv_chunk)
                k_j = kT_scr[pl.ds(off, kv_chunk), :]   # (KC, C) bf16
                v_j = vT_scr[pl.ds(off, kv_chunk), :]   # (KC, C) bf16
                sc = lax.dot_general(_q, k_j, (((1,), (1,)), ((), ())),
                                     preferred_element_type=jnp.float32) * sm_scale
                m_n = jnp.maximum(m_p, jnp.max(sc, axis=-1, keepdims=True))
                alpha = jnp.exp(m_p - m_n)
                p_j = jnp.exp(sc - m_n)
                l_n = alpha * l_p + jnp.sum(p_j, axis=-1, keepdims=True)
                acc_n = alpha * acc_p + jnp.dot(p_j.astype(jnp.bfloat16), v_j,
                                                preferred_element_type=jnp.float32)
                return m_n, l_n, acc_n

            init = (jnp.full((s, 1), -jnp.inf, jnp.float32),
                    jnp.zeros((s, 1), jnp.float32),
                    jnp.zeros((s, c), jnp.float32))
            _, l_i, acc = lax.fori_loop(0, n_kv, kv_step, init)

        attn_t = acc / l_i                              # exact divide: once per row
        # Output projection back in channel-first so the store stays lane-dense.
        attn_cf = jnp.transpose(attn_t).astype(jnp.bfloat16)              # (C, S)
        out_t = jnp.dot(wp_ref[...], attn_cf,
                        preferred_element_type=jnp.float32) + bp_ref[...]  # (C, S) f32
        o_ref[0, :, row0:row0 + s] = x_ref[0, :, row0:row0 + s] + out_t


def fuse_1x1(w1, b1, w2, b2):
    # Conv2Plus1d with kernel_size=1/stride=1/padding=0 is two chained pointwise
    # (1x1x1) convs:  W2 @ (W1 @ x + b1) + b2 == (W2 @ W1) @ x + (W2 @ b1 + b2)
    return w2 @ w1, w2 @ b1 + b2


def _pick_kv_chunk(s, max_chunk=512):
    """Largest KV chunk (<= max_chunk, multiple of 128) that tiles S."""
    if s <= max_chunk:
        return s
    kc = (max_chunk // 128) * 128
    while kc >= 128:
        if s % kc == 0:
            return kc
        kc -= 128
    return s  # TODO(synk): ragged S — falls back to a single (S, S) tile.


def attn_block(x, params, num_groups=32, eps=1e-6):
    """x: (b, c, t, h, w) float32 -> (b, c, t, h, w) float32 (AttnBlock.forward)."""
    b, c, t, h, w = x.shape
    s = h * w
    ts = t * s
    g = num_groups
    cg = c // g

    wq, bq = fuse_1x1(*params["q"])
    wk, bk = fuse_1x1(*params["k"])
    wv, bv = fuse_1x1(*params["v"])
    wp, bp = fuse_1x1(*params["proj"])

    # Fused QKV weight in (out, in) = (3C, C) layout: kernel does Wqkv @ h.
    wqkv = jnp.concatenate([wq, wk, wv], axis=0).astype(jnp.bfloat16)      # (3C, C)
    bqkv = jnp.concatenate([bq, bk, bv]).reshape(3 * c, 1).astype(jnp.float32)
    wp_b = wp.astype(jnp.bfloat16)                                         # (C, C)
    bp_c = bp.reshape(c, 1).astype(jnp.float32)
    gamma = params["gamma"].reshape(c, 1).astype(jnp.float32)
    beta = params["beta"].reshape(c, 1).astype(jnp.float32)
    # Block-diagonal group-averaging matrix (used in-kernel only when cg > 1).
    gmat = (jnp.kron(jnp.eye(g, dtype=jnp.float32),
                     jnp.ones((cg, cg), jnp.float32)) / float(cg * ts))

    kv_chunk = _pick_kv_chunk(s)
    n_kv = s // kv_chunk

    # Channel-first (B, C, T*S): a FREE reshape of NCTHW (no HBM transpose) whose
    # last dim keeps every HBM<->VMEM block lane-dense even at C = 32.
    x_cf = x.reshape(b, c, ts)

    kernel = functools.partial(attn_kernel, nt=t, s=s, c=c, cg=cg, eps=eps,
                               kv_chunk=kv_chunk, n_kv=n_kv)

    xspec = pl.BlockSpec((1, c, ts), lambda i: (i, 0, 0))
    in_specs = [
        xspec,
        pl.BlockSpec((c, 1), lambda i: (0, 0)),        # gamma
        pl.BlockSpec((c, 1), lambda i: (0, 0)),        # beta
        pl.BlockSpec((c, c), lambda i: (0, 0)),        # gmat
        pl.BlockSpec((3 * c, c), lambda i: (0, 0)),    # wqkv
        pl.BlockSpec((3 * c, 1), lambda i: (0, 0)),    # bqkv
        pl.BlockSpec((c, c), lambda i: (0, 0)),        # wp
        pl.BlockSpec((c, 1), lambda i: (0, 0)),        # bp
    ]

    # Per-step VMEM footprint -> explicit scoped-VMEM limit.
    cp = -(-c // 128) * 128                 # lane-padded channel width
    est = (4 * c * ts * 4                   # x + out blocks, double-buffered, f32
           + 3 * c * ts * 4                 # transient f32 qkv value
           + 3 * ts * cp * 2                # qT/kT/vT bf16 scratch (lane-padded)
           + s * kv_chunk * 6               # f32 score tile + bf16 probs
           + s * cp * 4)                    # attention accumulator
    # TODO(synk): cap at ~56 MiB when targeting v7x (64 MiB physical VMEM).
    vmem_limit = int(min(max(2 * est, 32 * 2 ** 20), 96 * 2 ** 20))

    out_cf = pl.pallas_call(
        kernel,
        out_shape=jax.ShapeDtypeStruct((b, c, ts), jnp.float32),
        grid=(b,),
        in_specs=in_specs,
        out_specs=xspec,
        scratch_shapes=[pltpu.VMEM((ts, c), jnp.bfloat16),   # qT
                        pltpu.VMEM((ts, c), jnp.bfloat16),   # kT
                        pltpu.VMEM((ts, c), jnp.bfloat16)],  # vT
        compiler_params=pltpu.CompilerParams(
            dimension_semantics=("parallel",),
            vmem_limit_bytes=vmem_limit),
    )(x_cf, gamma, beta, gmat, wqkv, bqkv, wp_b, bp_c)

    return out_cf.reshape(b, c, t, h, w)


# ----------------------------- pure-JAX reference -----------------------------

def group_norm(x, gamma, beta, num_groups=32, eps=1e-6):
    b, c, t, h, w = x.shape
    g = num_groups
    xg = x.reshape(b, g, c // g, t, h, w)
    mean = xg.mean(axis=(2, 3, 4, 5), keepdims=True)
    var = xg.var(axis=(2, 3, 4, 5), keepdims=True)
    xn = ((xg - mean) / jnp.sqrt(var + eps)).reshape(b, c, t, h, w)
    return xn * gamma[None, :, None, None, None] + beta[None, :, None, None, None]


def reference(x, params):
    """Pure-JAX (f32) reference of AttnBlock.forward (for correctness check)."""
    b, c, t, h, w = x.shape
    hn = group_norm(x, params["gamma"], params["beta"])

    def conv(a, p):
        w1, b1, w2, b2 = p
        y = jnp.einsum("oc,bcthw->bothw", w1, a) + b1[None, :, None, None, None]
        y = jnp.einsum("oc,bcthw->bothw", w2, y) + b2[None, :, None, None, None]
        return y

    q = conv(hn, params["q"])
    k = conv(hn, params["k"])
    v = conv(hn, params["v"])

    def to_seq(a):
        return a.transpose(0, 2, 3, 4, 1).reshape(b * t, h * w, c)

    qs, ks, vs = to_seq(q), to_seq(k), to_seq(v)
    sc = jnp.einsum("bqc,bkc->bqk", qs, ks) / jnp.sqrt(jnp.float32(c))
    p = jax.nn.softmax(sc, axis=-1)
    o = jnp.einsum("bqk,bkc->bqc", p, vs)
    o = o.reshape(b, t, h, w, c).transpose(0, 4, 1, 2, 3)
    return x + conv(o, params["proj"])


def init_params(key, c):
    ks = jax.random.split(key, 20)
    scale = 0.1

    def conv_pair(k0, k1, k2, k3):
        return (scale * jax.random.normal(k0, (c, c), jnp.float32),
                scale * jax.random.normal(k1, (c,), jnp.float32),
                scale * jax.random.normal(k2, (c, c), jnp.float32),
                scale * jax.random.normal(k3, (c,), jnp.float32))

    return {
        "gamma": 1.0 + 0.1 * jax.random.normal(ks[0], (c,), jnp.float32),
        "beta": 0.1 * jax.random.normal(ks[1], (c,), jnp.float32),
        "q": conv_pair(*ks[2:6]),
        "k": conv_pair(*ks[6:10]),
        "v": conv_pair(*ks[10:14]),
        "proj": conv_pair(*ks[14:18]),
    }


if __name__ == "__main__":
    # GroupNorm(num_groups=32) requires in_channels % 32 == 0 -> pick C = 32.
    b, c, t, h, w = 2, 32, 4, 8, 8
    key = jax.random.PRNGKey(0)
    kx, kp = jax.random.split(key)
    x = jax.random.normal(kx, (b, c, t, h, w), jnp.float32)
    params = init_params(kp, c)

    out = attn_block(x, params)
    out = jax.block_until_ready(out)

    ref = reference(x, params)
    err = float(jnp.max(jnp.abs(out - ref)))
    assert out.shape == x.shape and out.dtype == x.dtype
    # bf16 MXU inputs (f32 accumulation) vs. a pure-f32 reference.
    assert err < 5e-3, f"mismatch vs reference: max abs err = {err}"
    print("KERNEL_OK")
</pallas_src>

<mosaic_0001>
module attributes {stable_mosaic.version = 11 : i64} {
  func.func @attn_kernel(%arg0: i32, %arg1: memref<1x32x256xf32, #tpu.memory_space<vmem>>, %arg2: memref<32x1xf32, #tpu.memory_space<vmem>>, %arg3: memref<32x1xf32, #tpu.memory_space<vmem>>, %arg4: memref<32x32xf32, #tpu.memory_space<vmem>>, %arg5: memref<96x32xbf16, #tpu.memory_space<vmem>>, %arg6: memref<96x1xf32, #tpu.memory_space<vmem>>, %arg7: memref<32x32xbf16, #tpu.memory_space<vmem>>, %arg8: memref<32x1xf32, #tpu.memory_space<vmem>>, %arg9: memref<1x32x256xf32, #tpu.memory_space<vmem>>, %arg10: memref<256x32xbf16, #tpu.memory_space<vmem>>, %arg11: memref<256x32xbf16, #tpu.memory_space<vmem>>, %arg12: memref<256x32xbf16, #tpu.memory_space<vmem>>) attributes {dimension_semantics = [#tpu.dimension_semantics<parallel>], iteration_bounds = array<i64: 2>, scalar_prefetch = 0 : i64, scratch_operands = 3 : i64, tpu.core_type = #tpu.core_type<tc>, window_params = [{transform_indices = @transform_0, window_bounds = array<i64: 1, 32, 256>}, {pipeline_mode = #tpu.pipeline_mode<synchronous>, transform_indices = @transform_1, window_bounds = array<i64: 32, 1>}, {pipeline_mode = #tpu.pipeline_mode<synchronous>, transform_indices = @transform_2, window_bounds = array<i64: 32, 1>}, {pipeline_mode = #tpu.pipeline_mode<synchronous>, transform_indices = @transform_3, window_bounds = array<i64: 32, 32>}, {pipeline_mode = #tpu.pipeline_mode<synchronous>, transform_indices = @transform_4, window_bounds = array<i64: 96, 32>}, {pipeline_mode = #tpu.pipeline_mode<synchronous>, transform_indices = @transform_5, window_bounds = array<i64: 96, 1>}, {pipeline_mode = #tpu.pipeline_mode<synchronous>, transform_indices = @transform_6, window_bounds = array<i64: 32, 32>}, {pipeline_mode = #tpu.pipeline_mode<synchronous>, transform_indices = @transform_7, window_bounds = array<i64: 32, 1>}, {transform_indices = @transform_8, window_bounds = array<i64: 1, 32, 256>}]} {
    %c0 = arith.constant 0 : index
    %c0_0 = arith.constant 0 : index
    %c0_1 = arith.constant 0 : index
    %0 = vector.load %arg1[%c0, %c0_0, %c0_1] : memref<1x32x256xf32, #tpu.memory_space<vmem>>, vector<1x32x256xf32>
    %1 = vector.shape_cast %0 : vector<1x32x256xf32> to vector<32x256xf32>
    %cst = arith.constant dense<0.000000e+00> : vector<32xf32>
    %2 = vector.multi_reduction <add>, %1, %cst [1] : vector<32x256xf32> to vector<32xf32>
    %3 = vector.shape_cast %2 : vector<32xf32> to vector<32x1xf32>
    %4 = arith.mulf %1, %1 : vector<32x256xf32>
    %cst_2 = arith.constant dense<0.000000e+00> : vector<32xf32>
    %5 = vector.multi_reduction <add>, %4, %cst_2 [1] : vector<32x256xf32> to vector<32xf32>
    %6 = vector.shape_cast %5 : vector<32xf32> to vector<32x1xf32>
    %cst_3 = arith.constant 3.906250e-03 : f32
    %7 = vector.broadcast %cst_3 : f32 to vector<32x1xf32>
    %8 = arith.mulf %3, %7 : vector<32x1xf32>
    %cst_4 = arith.constant 3.906250e-03 : f32
    %9 = vector.broadcast %cst_4 : f32 to vector<32x1xf32>
    %10 = arith.mulf %6, %9 : vector<32x1xf32>
    %11 = arith.mulf %8, %8 : vector<32x1xf32>
    %12 = arith.subf %10, %11 : vector<32x1xf32>
    %cst_5 = arith.constant 9.99999997E-7 : f32
    %13 = vector.broadcast %cst_5 : f32 to vector<32x1xf32>
    %14 = arith.addf %12, %13 : vector<32x1xf32>
    %15 = math.rsqrt %14 : vector<32x1xf32>
    %c0_6 = arith.constant 0 : index
    %c0_7 = arith.constant 0 : index
    %16 = vector.load %arg2[%c0_6, %c0_7] : memref<32x1xf32, #tpu.memory_space<vmem>>, vector<32x1xf32>
    %17 = arith.mulf %15, %16 : vector<32x1xf32>
    %c0_8 = arith.constant 0 : index
    %c0_9 = arith.constant 0 : index
    %18 = vector.load %arg3[%c0_8, %c0_9] : memref<32x1xf32, #tpu.memory_space<vmem>>, vector<32x1xf32>
    %19 = arith.mulf %8, %17 : vector<32x1xf32>
    %20 = arith.subf %18, %19 : vector<32x1xf32>
    %21 = vector.broadcast %17 : vector<32x1xf32> to vector<32x256xf32>
    %22 = arith.mulf %1, %21 : vector<32x256xf32>
    %23 = vector.broadcast %20 : vector<32x1xf32> to vector<32x256xf32>
    %24 = arith.addf %22, %23 : vector<32x256xf32>
    %25 = arith.truncf %24 : vector<32x256xf32> to vector<32x256xbf16>
    %c0_10 = arith.constant 0 : index
    %c0_11 = arith.constant 0 : index
    %26 = vector.load %arg5[%c0_10, %c0_11] : memref<96x32xbf16, #tpu.memory_space<vmem>>, vector<96x32xbf16>
    %cst_12 = arith.constant dense<0.000000e+00> : vector<96x256xf32>
    %27 = tpu.matmul %26, %25, %cst_12 {dimension_numbers = #tpu.dot_dimension_numbers<[1], [0], [0], [1], [0, 0, 1, 1], [], []>} : vector<96x32xbf16>, vector<32x256xbf16>, vector<96x256xf32> -> vector<96x256xf32>
    %c0_13 = arith.constant 0 : index
    %c0_14 = arith.constant 0 : index
    %28 = vector.load %arg6[%c0_13, %c0_14] : memref<96x1xf32, #tpu.memory_space<vmem>>, vector<96x1xf32>
    %29 = vector.broadcast %28 : vector<96x1xf32> to vector<96x256xf32>
    %30 = arith.addf %27, %29 : vector<96x256xf32>
    %31 = vector.extract_strided_slice %30 {offsets = [0, 0], sizes = [32, 256], strides = [1, 1]} : vector<96x256xf32> to vector<32x256xf32>
    %32 = tpu.transpose %31, [1, 0] : vector<32x256xf32> -> vector<256x32xf32>
    %33 = arith.truncf %32 : vector<256x32xf32> to vector<256x32xbf16>
    %c0_15 = arith.constant 0 : index
    %c0_16 = arith.constant 0 : index
    %34 = vector.load %arg10[%c0_15, %c0_16] : memref<256x32xbf16, #tpu.memory_space<vmem>>, vector<256x32xbf16>
    tpu.vector_store %arg10[%c0_15, %c0_16], %33 {strides = array<i32>} : memref<256x32xbf16, #tpu.memory_space<vmem>>, vector<256x32xbf16>,
    %35 = vector.extract_strided_slice %30 {offsets = [32, 0], sizes = [32, 256], strides = [1, 1]} : vector<96x256xf32> to vector<32x256xf32>
    %36 = tpu.transpose %35, [1, 0] : vector<32x256xf32> -> vector<256x32xf32>
    %37 = arith.truncf %36 : vector<256x32xf32> to vector<256x32xbf16>
    %c0_17 = arith.constant 0 : index
    %c0_18 = arith.constant 0 : index
    %38 = vector.load %arg11[%c0_17, %c0_18] : memref<256x32xbf16, #tpu.memory_space<vmem>>, vector<256x32xbf16>
    tpu.vector_store %arg11[%c0_17, %c0_18], %37 {strides = array<i32>} : memref<256x32xbf16, #tpu.memory_space<vmem>>, vector<256x32xbf16>,
    %39 = vector.extract_strided_slice %30 {offsets = [64, 0], sizes = [32, 256], strides = [1, 1]} : vector<96x256xf32> to vector<32x256xf32>
    %40 = tpu.transpose %39, [1, 0] : vector<32x256xf32> -> vector<256x32xf32>
    %41 = arith.truncf %40 : vector<256x32xf32> to vector<256x32xbf16>
    %c0_19 = arith.constant 0 : index
    %c0_20 = arith.constant 0 : index
    %42 = vector.load %arg12[%c0_19, %c0_20] : memref<256x32xbf16, #tpu.memory_space<vmem>>, vector<256x32xbf16>
    tpu.vector_store %arg12[%c0_19, %c0_20], %41 {strides = array<i32>} : memref<256x32xbf16, #tpu.memory_space<vmem>>, vector<256x32xbf16>,
    %c0_21 = arith.constant 0 : index
    %c0_22 = arith.constant 0 : index
    %43 = vector.load %arg10[%c0_21, %c0_22] : memref<256x32xbf16, #tpu.memory_space<vmem>>, vector<64x32xbf16>
    %c0_23 = arith.constant 0 : index
    %c0_24 = arith.constant 0 : index
    %44 = vector.load %arg11[%c0_23, %c0_24] : memref<256x32xbf16, #tpu.memory_space<vmem>>, vector<64x32xbf16>
    %c0_25 = arith.constant 0 : index
    %c0_26 = arith.constant 0 : index
    %45 = vector.load %arg12[%c0_25, %c0_26] : memref<256x32xbf16, #tpu.memory_space<vmem>>, vector<64x32xbf16>
    %cst_27 = arith.constant dense<0.000000e+00> : vector<64x64xf32>
    %46 = tpu.matmul %43, %44, %cst_27 {dimension_numbers = #tpu.dot_dimension_numbers<[1], [1], [0], [0], [0, 0, 1, 0], [], []>} : vector<64x32xbf16>, vector<64x32xbf16>, vector<64x64xf32> -> vector<64x64xf32>
    %cst_28 = arith.constant 0.176776692 : f32
    %47 = vector.broadcast %cst_28 : f32 to vector<64x64xf32>
    %48 = arith.mulf %46, %47 : vector<64x64xf32>
    %cst_29 = arith.constant dense<0xFF800000> : vector<64xf32>
    %49 = vector.multi_reduction <maximumf>, %48, %cst_29 [1] : vector<64x64xf32> to vector<64xf32>
    %50 = vector.shape_cast %49 : vector<64xf32> to vector<64x1xf32>
    %51 = vector.broadcast %50 : vector<64x1xf32> to vector<64x64xf32>
    %52 = arith.subf %48, %51 : vector<64x64xf32>
    %53 = math.exp %52 : vector<64x64xf32>
    %cst_30 = arith.constant dense<0.000000e+00> : vector<64xf32>
    %54 = vector.multi_reduction <add>, %53, %cst_30 [1] : vector<64x64xf32> to vector<64xf32>
    %55 = vector.shape_cast %54 : vector<64xf32> to vector<64x1xf32>
    %56 = arith.truncf %53 : vector<64x64xf32> to vector<64x64xbf16>
    %cst_31 = arith.constant dense<0.000000e+00> : vector<64x32xf32>
    %57 = tpu.matmul %56, %45, %cst_31 {dimension_numbers = #tpu.dot_dimension_numbers<[1], [0], [0], [1], [0, 0, 1, 1], [], []>} : vector<64x64xbf16>, vector<64x32xbf16>, vector<64x32xf32> -> vector<64x32xf32>
    %58 = vector.broadcast %55 : vector<64x1xf32> to vector<64x32xf32>
    %59 = arith.divf %57, %58 : vector<64x32xf32>
    %60 = tpu.transpose %59, [1, 0] : vector<64x32xf32> -> vector<32x64xf32>
    %61 = arith.truncf %60 : vector<32x64xf32> to vector<32x64xbf16>
    %c0_32 = arith.constant 0 : index
    %c0_33 = arith.constant 0 : index
    %62 = vector.load %arg7[%c0_32, %c0_33] : memref<32x32xbf16, #tpu.memory_space<vmem>>, vector<32x32xbf16>
    %cst_34 = arith.constant dense<0.000000e+00> : vector<32x64xf32>
    %63 = tpu.matmul %62, %61, %cst_34 {dimension_numbers = #tpu.dot_dimension_numbers<[1], [0], [0], [1], [0, 0, 1, 1], [], []>} : vector<32x32xbf16>, vector<32x64xbf16>, vector<32x64xf32> -> vector<32x64xf32>
    %c0_35 = arith.constant 0 : index
    %c0_36 = arith.constant 0 : index
    %64 = vector.load %arg8[%c0_35, %c0_36] : memref<32x1xf32, #tpu.memory_space<vmem>>, vector<32x1xf32>
    %65 = vector.broadcast %64 : vector<32x1xf32> to vector<32x64xf32>
    %66 = arith.addf %63, %65 : vector<32x64xf32>
    %c0_37 = arith.constant 0 : index
    %c0_38 = arith.constant 0 : index
    %c0_39 = arith.constant 0 : index
    %67 = vector.load %arg1[%c0_37, %c0_38, %c0_39] : memref<1x32x256xf32, #tpu.memory_space<vmem>>, vector<1x32x64xf32>
    %68 = vector.shape_cast %67 : vector<1x32x64xf32> to vector<32x64xf32>
    %69 = arith.addf %68, %66 : vector<32x64xf32>
    %c0_40 = arith.constant 0 : index
    %c0_41 = arith.constant 0 : index
    %c0_42 = arith.constant 0 : index
    %70 = vector.load %arg9[%c0_40, %c0_41, %c0_42] : memref<1x32x256xf32, #tpu.memory_space<vmem>>, vector<1x32x64xf32>
    %71 = vector.shape_cast %70 : vector<1x32x64xf32> to vector<32x64xf32>
    %72 = vector.shape_cast %69 : vector<32x64xf32> to vector<1x32x64xf32>
    tpu.vector_store %arg9[%c0_40, %c0_41, %c0_42], %72 {strides = array<i32>} : memref<1x32x256xf32, #tpu.memory_space<vmem>>, vector<1x32x64xf32>,
    %c64 = arith.constant 64 : index
    %c0_43 = arith.constant 0 : index
    %73 = vector.load %arg10[%c64, %c0_43] : memref<256x32xbf16, #tpu.memory_space<vmem>>, vector<64x32xbf16>
    %c64_44 = arith.constant 64 : index
    %c0_45 = arith.constant 0 : index
    %74 = vector.load %arg11[%c64_44, %c0_45] : memref<256x32xbf16, #tpu.memory_space<vmem>>, vector<64x32xbf16>
    %c64_46 = arith.constant 64 : index
    %c0_47 = arith.constant 0 : index
    %75 = vector.load %arg12[%c64_46, %c0_47] : memref<256x32xbf16, #tpu.memory_space<vmem>>, vector<64x32xbf16>
    %cst_48 = arith.constant dense<0.000000e+00> : vector<64x64xf32>
    %76 = tpu.matmul %73, %74, %cst_48 {dimension_numbers = #tpu.dot_dimension_numbers<[1], [1], [0], [0], [0, 0, 1, 0], [], []>} : vector<64x32xbf16>, vector<64x32xbf16>, vector<64x64xf32> -> vector<64x64xf32>
    %cst_49 = arith.constant 0.176776692 : f32
    %77 = vector.broadcast %cst_49 : f32 to vector<64x64xf32>
    %78 = arith.mulf %76, %77 : vector<64x64xf32>
    %cst_50 = arith.constant dense<0xFF800000> : vector<64xf32>
    %79 = vector.multi_reduction <maximumf>, %78, %cst_50 [1] : vector<64x64xf32> to vector<64xf32>
    %80 = vector.shape_cast %79 : vector<64xf32> to vector<64x1xf32>
    %81 = vector.broadcast %80 : vector<64x1xf32> to vector<64x64xf32>
    %82 = arith.subf %78, %81 : vector<64x64xf32>
    %83 = math.exp %82 : vector<64x64xf32>
    %cst_51 = arith.constant dense<0.000000e+00> : vector<64xf32>
    %84 = vector.multi_reduction <add>, %83, %cst_51 [1] : vector<64x64xf32> to vector<64xf32>
    %85 = vector.shape_cast %84 : vector<64xf32> to vector<64x1xf32>
    %86 = arith.truncf %83 : vector<64x64xf32> to vector<64x64xbf16>
    %cst_52 = arith.constant dense<0.000000e+00> : vector<64x32xf32>
    %87 = tpu.matmul %86, %75, %cst_52 {dimension_numbers = #tpu.dot_dimension_numbers<[1], [0], [0], [1], [0, 0, 1, 1], [], []>} : vector<64x64xbf16>, vector<64x32xbf16>, vector<64x32xf32> -> vector<64x32xf32>
    %88 = vector.broadcast %85 : vector<64x1xf32> to vector<64x32xf32>
    %89 = arith.divf %87, %88 : vector<64x32xf32>
    %90 = tpu.transpose %89, [1, 0] : vector<64x32xf32> -> vector<32x64xf32>
    %91 = arith.truncf %90 : vector<32x64xf32> to vector<32x64xbf16>
    %c0_53 = arith.constant 0 : index
    %c0_54 = arith.constant 0 : index
    %92 = vector.load %arg7[%c0_53, %c0_54] : memref<32x32xbf16, #tpu.memory_space<vmem>>, vector<32x32xbf16>
    %cst_55 = arith.constant dense<0.000000e+00> : vector<32x64xf32>
    %93 = tpu.matmul %92, %91, %cst_55 {dimension_numbers = #tpu.dot_dimension_numbers<[1], [0], [0], [1], [0, 0, 1, 1], [], []>} : vector<32x32xbf16>, vector<32x64xbf16>, vector<32x64xf32> -> vector<32x64xf32>
    %c0_56 = arith.constant 0 : index
    %c0_57 = arith.constant 0 : index
    %94 = vector.load %arg8[%c0_56, %c0_57] : memref<32x1xf32, #tpu.memory_space<vmem>>, vector<32x1xf32>
    %95 = vector.broadcast %94 : vector<32x1xf32> to vector<32x64xf32>
    %96 = arith.addf %93, %95 : vector<32x64xf32>
    %c0_58 = arith.constant 0 : index
    %c0_59 = arith.constant 0 : index
    %c64_60 = arith.constant 64 : index
    %97 = vector.load %arg1[%c0_58, %c0_59, %c64_60] : memref<1x32x256xf32, #tpu.memory_space<vmem>>, vector<1x32x64xf32>
    %98 = vector.shape_cast %97 : vector<1x32x64xf32> to vector<32x64xf32>
    %99 = arith.addf %98, %96 : vector<32x64xf32>
    %c0_61 = arith.constant 0 : index
    %c0_62 = arith.constant 0 : index
    %c64_63 = arith.constant 64 : index
    %100 = vector.load %arg9[%c0_61, %c0_62, %c64_63] : memref<1x32x256xf32, #tpu.memory_space<vmem>>, vector<1x32x64xf32>
    %101 = vector.shape_cast %100 : vector<1x32x64xf32> to vector<32x64xf32>
    %102 = vector.shape_cast %99 : vector<32x64xf32> to vector<1x32x64xf32>
    tpu.vector_store %arg9[%c0_61, %c0_62, %c64_63], %102 {strides = array<i32>} : memref<1x32x256xf32, #tpu.memory_space<vmem>>, vector<1x32x64xf32>,
    %c128 = arith.constant 128 : index
    %c0_64 = arith.constant 0 : index
    %103 = vector.load %arg10[%c128, %c0_64] : memref<256x32xbf16, #tpu.memory_space<vmem>>, vector<64x32xbf16>
    %c128_65 = arith.constant 128 : index
    %c0_66 = arith.constant 0 : index
    %104 = vector.load %arg11[%c128_65, %c0_66] : memref<256x32xbf16, #tpu.memory_space<vmem>>, vector<64x32xbf16>
    %c128_67 = arith.constant 128 : index
    %c0_68 = arith.constant 0 : index
    %105 = vector.load %arg12[%c128_67, %c0_68] : memref<256x32xbf16, #tpu.memory_space<vmem>>, vector<64x32xbf16>
    %cst_69 = arith.constant dense<0.000000e+00> : vector<64x64xf32>
    %106 = tpu.matmul %103, %104, %cst_69 {dimension_numbers = #tpu.dot_dimension_numbers<[1], [1], [0], [0], [0, 0, 1, 0], [], []>} : vector<64x32xbf16>, vector<64x32xbf16>, vector<64x64xf32> -> vector<64x64xf32>
    %cst_70 = arith.constant 0.176776692 : f32
    %107 = vector.broadcast %cst_70 : f32 to vector<64x64xf32>
    %108 = arith.mulf %106, %107 : vector<64x64xf32>
    %cst_71 = arith.constant dense<0xFF800000> : vector<64xf32>
    %109 = vector.multi_reduction <maximumf>, %108, %cst_71 [1] : vector<64x64xf32> to vector<64xf32>
    %110 = vector.shape_cast %109 : vector<64xf32> to vector<64x1xf32>
    %111 = vector.broadcast %110 : vector<64x1xf32> to vector<64x64xf32>
    %112 = arith.subf %108, %111 : vector<64x64xf32>
    %113 = math.exp %112 : vector<64x64xf32>
    %cst_72 = arith.constant dense<0.000000e+00> : vector<64xf32>
    %114 = vector.multi_reduction <add>, %113, %cst_72 [1] : vector<64x64xf32> to vector<64xf32>
    %115 = vector.shape_cast %114 : vector<64xf32> to vector<64x1xf32>
    %116 = arith.truncf %113 : vector<64x64xf32> to vector<64x64xbf16>
    %cst_73 = arith.constant dense<0.000000e+00> : vector<64x32xf32>
    %117 = tpu.matmul %116, %105, %cst_73 {dimension_numbers = #tpu.dot_dimension_numbers<[1], [0], [0], [1], [0, 0, 1, 1], [], []>} : vector<64x64xbf16>, vector<64x32xbf16>, vector<64x32xf32> -> vector<64x32xf32>
    %118 = vector.broadcast %115 : vector<64x1xf32> to vector<64x32xf32>
    %119 = arith.divf %117, %118 : vector<64x32xf32>
    %120 = tpu.transpose %119, [1, 0] : vector<64x32xf32> -> vector<32x64xf32>
    %121 = arith.truncf %120 : vector<32x64xf32> to vector<32x64xbf16>
    %c0_74 = arith.constant 0 : index
    %c0_75 = arith.constant 0 : index
    %122 = vector.load %arg7[%c0_74, %c0_75] : memref<32x32xbf16, #tpu.memory_space<vmem>>, vector<32x32xbf16>
    %cst_76 = arith.constant dense<0.000000e+00> : vector<32x64xf32>
    %123 = tpu.matmul %122, %121, %cst_76 {dimension_numbers = #tpu.dot_dimension_numbers<[1], [0], [0], [1], [0, 0, 1, 1], [], []>} : vector<32x32xbf16>, vector<32x64xbf16>, vector<32x64xf32> -> vector<32x64xf32>
    %c0_77 = arith.constant 0 : index
    %c0_78 = arith.constant 0 : index
    %124 = vector.load %arg8[%c0_77, %c0_78] : memref<32x1xf32, #tpu.memory_space<vmem>>, vector<32x1xf32>
    %125 = vector.broadcast %124 : vector<32x1xf32> to vector<32x64xf32>
    %126 = arith.addf %123, %125 : vector<32x64xf32>
    %c0_79 = arith.constant 0 : index
    %c0_80 = arith.constant 0 : index
    %c128_81 = arith.constant 128 : index
    %127 = vector.load %arg1[%c0_79, %c0_80, %c128_81] : memref<1x32x256xf32, #tpu.memory_space<vmem>>, vector<1x32x64xf32>
    %128 = vector.shape_cast %127 : vector<1x32x64xf32> to vector<32x64xf32>
    %129 = arith.addf %128, %126 : vector<32x64xf32>
    %c0_82 = arith.constant 0 : index
    %c0_83 = arith.constant 0 : index
    %c128_84 = arith.constant 128 : index
    %130 = vector.load %arg9[%c0_82, %c0_83, %c128_84] : memref<1x32x256xf32, #tpu.memory_space<vmem>>, vector<1x32x64xf32>
    %131 = vector.shape_cast %130 : vector<1x32x64xf32> to vector<32x64xf32>
    %132 = vector.shape_cast %129 : vector<32x64xf32> to vector<1x32x64xf32>
    tpu.vector_store %arg9[%c0_82, %c0_83, %c128_84], %132 {strides = array<i32>} : memref<1x32x256xf32, #tpu.memory_space<vmem>>, vector<1x32x64xf32>,
    %c192 = arith.constant 192 : index
    %c0_85 = arith.constant 0 : index
    %133 = vector.load %arg10[%c192, %c0_85] : memref<256x32xbf16, #tpu.memory_space<vmem>>, vector<64x32xbf16>
    %c192_86 = arith.constant 192 : index
    %c0_87 = arith.constant 0 : index
    %134 = vector.load %arg11[%c192_86, %c0_87] : memref<256x32xbf16, #tpu.memory_space<vmem>>, vector<64x32xbf16>
    %c192_88 = arith.constant 192 : index
    %c0_89 = arith.constant 0 : index
    %135 = vector.load %arg12[%c192_88, %c0_89] : memref<256x32xbf16, #tpu.memory_space<vmem>>, vector<64x32xbf16>
    %cst_90 = arith.constant dense<0.000000e+00> : vector<64x64xf32>
    %136 = tpu.matmul %133, %134, %cst_90 {dimension_numbers = #tpu.dot_dimension_numbers<[1], [1], [0], [0], [0, 0, 1, 0], [], []>} : vector<64x32xbf16>, vector<64x32xbf16>, vector<64x64xf32> -> vector<64x64xf32>
    %cst_91 = arith.constant 0.176776692 : f32
    %137 = vector.broadcast %cst_91 : f32 to vector<64x64xf32>
    %138 = arith.mulf %136, %137 : vector<64x64xf32>
    %cst_92 = arith.constant dense<0xFF800000> : vector<64xf32>
    %139 = vector.multi_reduction <maximumf>, %138, %cst_92 [1] : vector<64x64xf32> to vector<64xf32>
    %140 = vector.shape_cast %139 : vector<64xf32> to vector<64x1xf32>
    %141 = vector.broadcast %140 : vector<64x1xf32> to vector<64x64xf32>
    %142 = arith.subf %138, %141 : vector<64x64xf32>
    %143 = math.exp %142 : vector<64x64xf32>
    %cst_93 = arith.constant dense<0.000000e+00> : vector<64xf32>
    %144 = vector.multi_reduction <add>, %143, %cst_93 [1] : vector<64x64xf32> to vector<64xf32>
    %145 = vector.shape_cast %144 : vector<64xf32> to vector<64x1xf32>
    %146 = arith.truncf %143 : vector<64x64xf32> to vector<64x64xbf16>
    %cst_94 = arith.constant dense<0.000000e+00> : vector<64x32xf32>
    %147 = tpu.matmul %146, %135, %cst_94 {dimension_numbers = #tpu.dot_dimension_numbers<[1], [0], [0], [1], [0, 0, 1, 1], [], []>} : vector<64x64xbf16>, vector<64x32xbf16>, vector<64x32xf32> -> vector<64x32xf32>
    %148 = vector.broadcast %145 : vector<64x1xf32> to vector<64x32xf32>
    %149 = arith.divf %147, %148 : vector<64x32xf32>
    %150 = tpu.transpose %149, [1, 0] : vector<64x32xf32> -> vector<32x64xf32>
    %151 = arith.truncf %150 : vector<32x64xf32> to vector<32x64xbf16>
    %c0_95 = arith.constant 0 : index
    %c0_96 = arith.constant 0 : index
    %152 = vector.load %arg7[%c0_95, %c0_96] : memref<32x32xbf16, #tpu.memory_space<vmem>>, vector<32x32xbf16>
    %cst_97 = arith.constant dense<0.000000e+00> : vector<32x64xf32>
    %153 = tpu.matmul %152, %151, %cst_97 {dimension_numbers = #tpu.dot_dimension_numbers<[1], [0], [0], [1], [0, 0, 1, 1], [], []>} : vector<32x32xbf16>, vector<32x64xbf16>, vector<32x64xf32> -> vector<32x64xf32>
    %c0_98 = arith.constant 0 : index
    %c0_99 = arith.constant 0 : index
    %154 = vector.load %arg8[%c0_98, %c0_99] : memref<32x1xf32, #tpu.memory_space<vmem>>, vector<32x1xf32>
    %155 = vector.broadcast %154 : vector<32x1xf32> to vector<32x64xf32>
    %156 = arith.addf %153, %155 : vector<32x64xf32>
    %c0_100 = arith.constant 0 : index
    %c0_101 = arith.constant 0 : index
    %c192_102 = arith.constant 192 : index
    %157 = vector.load %arg1[%c0_100, %c0_101, %c192_102] : memref<1x32x256xf32, #tpu.memory_space<vmem>>, vector<1x32x64xf32>
    %158 = vector.shape_cast %157 : vector<1x32x64xf32> to vector<32x64xf32>
    %159 = arith.addf %158, %156 : vector<32x64xf32>
    %c0_103 = arith.constant 0 : index
    %c0_104 = arith.constant 0 : index
    %c192_105 = arith.constant 192 : index
    %160 = vector.load %arg9[%c0_103, %c0_104, %c192_105] : memref<1x32x256xf32, #tpu.memory_space<vmem>>, vector<1x32x64xf32>
    %161 = vector.shape_cast %160 : vector<1x32x64xf32> to vector<32x64xf32>
    %162 = vector.shape_cast %159 : vector<32x64xf32> to vector<1x32x64xf32>
    tpu.vector_store %arg9[%c0_103, %c0_104, %c192_105], %162 {strides = array<i32>} : memref<1x32x256xf32, #tpu.memory_space<vmem>>, vector<1x32x64xf32>,
    return
  }
  func.func @transform_0(%arg0: i32) -> (i32, i32, i32) {
    %c0_i32 = arith.constant 0 : i32
    %c0_i32_0 = arith.constant 0 : i32
    %c0_i32_1 = arith.constant 0 : i32
    return %arg0, %c0_i32, %c0_i32_0 : i32, i32, i32
  }
  func.func @transform_1(%arg0: i32) -> (i32, i32) {
    %c0_i32 = arith.constant 0 : i32
    %c0_i32_0 = arith.constant 0 : i32
    %c0_i32_1 = arith.constant 0 : i32
    return %c0_i32, %c0_i32_0 : i32, i32
  }
  func.func @transform_2(%arg0: i32) -> (i32, i32) {
    %c0_i32 = arith.constant 0 : i32
    %c0_i32_0 = arith.constant 0 : i32
    %c0_i32_1 = arith.constant 0 : i32
    return %c0_i32, %c0_i32_0 : i32, i32
  }
  func.func @transform_3(%arg0: i32) -> (i32, i32) {
    %c0_i32 = arith.constant 0 : i32
    %c0_i32_0 = arith.constant 0 : i32
    %c0_i32_1 = arith.constant 0 : i32
    return %c0_i32, %c0_i32_0 : i32, i32
  }
  func.func @transform_4(%arg0: i32) -> (i32, i32) {
    %c0_i32 = arith.constant 0 : i32
    %c0_i32_0 = arith.constant 0 : i32
    %c0_i32_1 = arith.constant 0 : i32
    return %c0_i32, %c0_i32_0 : i32, i32
  }
  func.func @transform_5(%arg0: i32) -> (i32, i32) {
    %c0_i32 = arith.constant 0 : i32
    %c0_i32_0 = arith.constant 0 : i32
    %c0_i32_1 = arith.constant 0 : i32
    return %c0_i32, %c0_i32_0 : i32, i32
  }
  func.func @transform_6(%arg0: i32) -> (i32, i32) {
    %c0_i32 = arith.constant 0 : i32
    %c0_i32_0 = arith.constant 0 : i32
    %c0_i32_1 = arith.constant 0 : i32
    return %c0_i32, %c0_i32_0 : i32, i32
  }
  func.func @transform_7(%arg0: i32) -> (i32, i32) {
    %c0_i32 = arith.constant 0 : i32
    %c0_i32_0 = arith.constant 0 : i32
    %c0_i32_1 = arith.constant 0 : i32
    return %c0_i32, %c0_i32_0 : i32, i32
  }
  func.func @transform_8(%arg0: i32) -> (i32, i32, i32) {
    %c0_i32 = arith.constant 0 : i32
    %c0_i32_0 = arith.constant 0 : i32
    %c0_i32_1 = arith.constant 0 : i32
    return %arg0, %c0_i32, %c0_i32_0 : i32, i32, i32
  }
}

</mosaic_0001>

<bundles_post_ra>
// kernel: tpu_custom_call.1
= control target key start
LH: loop header
LB: loop body
LE: loop exit
PB: predicated region body
PF: predicated region fallthrough
CT: control target
= control target key end

     0   :  { %13 = vsyncpa [#allocation6], 0  ;;  %s5447_s0 = inlined_call_operand.vmem [shape: f32[2,32,256], index: 0, kind: input, shape index: {}]   ;;  %s5448_s1 = inlined_call_operand.vmem [shape: f32[32,1], index: 1, kind: input, shape index: {}]   ;;  %s5449_s2 = inlined_call_operand.vmem [shape: f32[32,1], index: 2, kind: input, shape index: {}]   ;;  %s5450_s3 = inlined_call_operand.vmem [shape: f32[32,32], index: 3, kind: input, shape index: {}]   ;;  %s5451_s4 = inlined_call_operand.vmem [shape: bf16[96,32], index: 4, kind: input, shape index: {}]   ;;  %s5452_s5 = inlined_call_operand.vmem [shape: f32[96,1], index: 5, kind: input, shape index: {}]   ;;  %s5453_s6 = inlined_call_operand.vmem [shape: bf16[32,32], index: 6, kind: input, shape index: {}]   ;;  %s5454_s7 = inlined_call_operand.vmem [shape: f32[32,1], index: 7, kind: input, shape index: {}]   ;;  %s5455_s8 = inlined_call_operand.hbm [shape: f32[2,32,256], index: 8, kind: output, shape index: {}]  }
   0x1   :  { %15 = vsyncpa [#allocation6 + $0x1], 0  ;;  %s4444_s27 = smov 0   ;;  %s4446_s3 = smov 0  }
   0x2   :  { %s4448_s28 = smov 0   ;;  %s4450_s29 = smov 0  }
   0x3 LB: > { %s4465_s30 = sadd.s32 4294967295, %s4392_s29   ;;  %s3430_s9 = sadd.s32 4294967294, %s4392_s29   ;;  %s4392_s29 = sphi %s4450_s29, %s5461_s29   ;;  %s4388_s28 = sphi %s4448_s28, %s5460_s28   ;;  %s4384_s3 = sphi %s4446_s3, %s5459_s3   ;;  %s4380_s27 = sphi %s4444_s27, %s5458_s27  }
   0x4   : > { %s4469_s10 = sadd.s32 1, %s4392_s29   ;;  %s201_s11 = sadd.s32 1, %s4388_s28 }
   0x5   : > { %s198_s12 = ssub.s32 %s4392_s29, %s4469_s10  ;;  %p211_p0 = scmp.ne.s32.totalorder %s4388_s28, %s4384_s3 }
   0x6   : > { %p199_p1 = scmp.eq.s32.totalorder %s198_s12, 0  ;;  %p212_p2 = scmp.eq.s32.totalorder %s4465_s30, 1 }
   0x7   : > { %p217_p3 = scmp.ne.s32.totalorder %s4384_s3, %s4380_s27  ;;  %p218_p4 = scmp.eq.s32.totalorder %s3430_s9, 1 }
   0x8   : > { %s4480_s13 = scalar_select %p199_p1, %s4388_s28, %s201_s11  }
   0x9   : > { %p4482_p5 = por %p212_p2, %p211_p0  ;;  %p4486_p6 = por %p218_p4, %p217_p3 }
   0xa   : > { %p3433_p7 = scmp.ge.s32.totalorder %s4392_s29, 1  ;;  %p265_p8 = scmp.lt.s32.totalorder %s4392_s29, 3 }
   0xc   : > { %p266_p9 = pnand %p3433_p7, %p265_p8 }
   0xd   : > { %p299_p10 = scmp.lt.s32.totalorder (!%p266_p9), %s4465_s30, 1  ;;  %s4395_s11 = smov (!%p266_p9), 64  }
   0xe   : > { %269 = sbr.rel (%p266_p9) target bundleno = 3045 (0xbe5), region = 52  ;;  %s296_s12 = sand.u32 (!%p266_p9), 1, %s4384_s3  }
  0x13   : > { %s300_s16 = scalar_select %p299_p10, %s4465_s30, 1  ;;  %v4394_v24 = vmov 0   ;;  %v371_v53 = vld [vmem:[%s5448_s1 + $0x10] sm:$0xff]  ;;  %v372_v56 = vld [vmem:[%s5448_s1 + $0x18] sm:$0xff]  ;;  %v466_v58 = vld [vmem:[%s5452_s5 + $0x28] sm:$0xff]  ;;  %vm563_vm0 = vcmask 261120  }
  0x14   : > { %4044 = vset.pattern.permute.xlu0 %v4394_v24  ;;  %4045 = vset.pattern.permute.xlu1 %v4394_v24  ;;  %v369_v60 = vld [vmem:[%s5448_s1] sm:$0xff]  ;;  %v468_v63 = vld [vmem:[%s5452_s5 + $0x38] sm:$0xff]  ;;  %vm867_vm1 = vcmask 257024   ;;  %vm1509_vm2 = vcmask 523264   ;;  %vm2347_vm3 = vcmask 1048064  }
  0x15   : > { %s3646_s17 = sshll.u32 %s300_s16, 6  ;;  %614 = vmatprep.mubr.bf16.mxu0 %v4394_v24  ;;  %s3434_s16 = sshll.u32 %s296_s12, 6 }
  0x16   : > { %s4497_s20 = scalar_lea.vmem %s5447_s0, %s3646_s17  ;;  %s5313_s17 = scalar_lea.vmem [#allocation5], %s3434_s16 }
  0x17   : > { %v4500_v0 = vld [vmem:[%s4497_s20 + $0x20] sm:$0xff]  ;;  %v4503_v1 = vld [vmem:[%s4497_s20 + $0x28] sm:$0xff]  ;;  %v4506_v2 = vld [vmem:[%s4497_s20 + $0x10] sm:$0xff]  ;;  %s3368_s23 = sshll.u32 %s5313_s17, 4  ;;  %s5401_s23 = int_to_ptr.vmem [resolvable:$true] %s3368_s23 }
  0x18   : > { %v319_v3 = vadd.f32 %v4503_v1, %v4500_v0  ;;  %v4511_v4 = vld [vmem:[%s4497_s20 + $0x18] sm:$0xff]  ;;  %v4514_v5 = vld [vmem:[%s4497_s20 + $0x30] sm:$0xff]  ;;  %v329_v7 = vmul.f32 %v4500_v0, %v4500_v0  ;;  %v330_v8 = vmul.f32 %v4503_v1, %v4503_v1  ;;  %v4526_v10 = vld [vmem:[%s4497_s20] sm:$0xff]  ;;  %v327_v20 = vmul.f32 %v4506_v2, %v4506_v2  ;;  %s4332_s9 = scalar_lea.vmem %s5401_s23, 1024 }
  0x19   : > { %v4517_v6 = vld [vmem:[%s4497_s20 + $0x38] sm:$0xff]  ;;  %v316_v9 = vadd.f32 %v4511_v4, %v4506_v2  ;;  %v4529_v11 = vld [vmem:[%s4497_s20 + $0x8] sm:$0xff]  ;;  %v331_v14 = vmul.f32 %v4514_v5, %v4514_v5  ;;  %v325_v17 = vmul.f32 %v4526_v10, %v4526_v10  ;;  %v328_v21 = vmul.f32 %v4511_v4, %v4511_v4  ;;  %p4333_p11 = scmp.ne.s32.totalorder %s5401_s23, %s4332_s9 }
  0x1a   : > { %320 = vadd.xlane.f32.xlu0 %v319_v3  ;;  %v322_v12 = vadd.f32 %v4517_v6, %v4514_v5  ;;  %v339_v13 = vadd.f32 %v330_v8, %v329_v7  ;;  %v332_v15 = vmul.f32 %v4517_v6, %v4517_v6  ;;  %v313_v16 = vadd.f32 %v4529_v11, %v4526_v10  ;;  %v370_v7 = vld [vmem:[%s5448_s1 + $0x8] sm:$0xff] }
  0x1b   : > { %317 = vadd.xlane.f32.xlu1 %v316_v9  ;;  %v326_v18 = vmul.f32 %v4529_v11, %v4529_v11  ;;  %v336_v23 = vadd.f32 %v328_v21, %v327_v20  ;;  %v462_v8 = vld [vmem:[%s5452_s5 + $0x8] sm:$0xff]  ;;  %v377_v20 = vld [vmem:[%s5449_s2] sm:$0xff]  ;;  %p4334_p12 = pnand %p4333_p11, %p4482_p5 }
  0x1c   : > { %v342_v19 = vadd.f32 %v332_v15, %v331_v14  ;;  %v464_v14 = vld [vmem:[%s5452_s5 + $0x18] sm:$0xff] }
  0x1d   : > { %v333_v22 = vadd.f32 %v326_v18, %v325_v17  ;;  %v380_v17 = vld [vmem:[%s5449_s2 + $0x18] sm:$0xff]  ;;  %p4335_p13 = pneg %p4334_p12 }
  0x1e   : > { %323 = vadd.xlane.f32.xlu0 %v322_v12 }
  0x1f   : > { %340 = vadd.xlane.f32.xlu1 %v339_v13  ;;  %v379_v13 = vld [vmem:[%s5449_s2 + $0x10] sm:$0xff] }
  0x22   : > { %314 = vadd.xlane.f32.xlu0 %v313_v16 }
  0x23   : > { %343 = vadd.xlane.f32.xlu1 %v342_v19 }
  0x26   : > { %334 = vadd.xlane.f32.xlu0 %v333_v22 }
  0x27   : > { %337 = vadd.xlane.f32.xlu1 %v336_v23  ;;  %v378_v23 = vld [vmem:[%s5449_s2 + $0x8] sm:$0xff] }
  0xa3   : > { %v321_v25 = vpop.xlane.xlu0 %320 }
  0xa4   : > { %v318_v26 = vpop.xlane.xlu1 %317  ;;  %v347_v27 = vmul.f32 0.00390625, %v321_v25 }
  0xa5   : > { %v346_v37 = vmul.f32 0.00390625, %v318_v26  ;;  %v465_v26 = vld [vmem:[%s5452_s5 + $0x20] sm:$0xff] }
  0xa6   : > { %v355_v30 = vmul.f32 %v347_v27, %v347_v27 }
  0xa7   : > { %v324_v28 = vpop.xlane.xlu0 %323  ;;  %v354_v46 = vmul.f32 %v346_v37, %v346_v37 }
  0xa8   : > { %v341_v29 = vpop.xlane.xlu1 %340  ;;  %v348_v31 = vmul.f32 0.00390625, %v324_v28  ;;  %v461_v28 = vld [vmem:[%s5452_s5] sm:$0xff] }
  0xa9   : > { %v351_v32 = vmul.f32 0.00390625, %v341_v29  ;;  %v463_v29 = vld [vmem:[%s5452_s5 + $0x10] sm:$0xff] }
  0xaa   : > { %v356_v38 = vmul.f32 %v348_v31, %v348_v31 }
  0xab   : > { %v359_v33 = vsub.f32 %v351_v32, %v355_v30  ;;  %v315_v34 = vpop.xlane.xlu0 %314 }
  0xac   : > { %v344_v35 = vpop.xlane.xlu1 %343  ;;  %v345_v36 = vmul.f32 0.00390625, %v315_v34 }
  0xad   : > { %v363_v39 = vadd.f32 1e-06, %v359_v33  ;;  %v352_v40 = vmul.f32 0.00390625, %v344_v35 }
  0xae   : > { %v353_v43 = vmul.f32 %v345_v36, %v345_v36 }
  0xaf   : > { %4196 = vrsqrt.f32 %v363_v39  ;;  %v360_v41 = vsub.f32 %v352_v40, %v356_v38  ;;  %v335_v42 = vpop.xlane.xlu0 %334 }
  0xb0   : > { %v338_v44 = vpop.xlane.xlu1 %337  ;;  %v349_v45 = vmul.f32 0.00390625, %v335_v42 }
  0xb1   : > { %v364_v47 = vadd.f32 1e-06, %v360_v41  ;;  %v350_v48 = vmul.f32 0.00390625, %v338_v44 }
  0xb2   : > { %v357_v49 = vsub.f32 %v349_v45, %v353_v43 }
  0xb3   : > { %4198 = vrsqrt.f32 %v364_v47  ;;  %v358_v50 = vsub.f32 %v350_v48, %v354_v46 }
  0xb4   : > { %v361_v51 = vadd.f32 1e-06, %v357_v49 }
  0xb5   : > { %v362_v52 = vadd.f32 1e-06, %v358_v50 }
  0xb6   : > { %4200 = vrsqrt.f32 %v361_v51 }
  0xb7   : > { %4202 = vrsqrt.f32 %v362_v52 }
  0xbc   : > { %v4197_v54 = vpop.eup %4196 }
  0xbd   : > { %v375_v55 = vmul.f32 %v4197_v54, %v371_v53  ;;  %v4134_v54 = vld [vmem:[%s5451_s4] sm:$0xff]  }
  0xbf   : > { %401 = vperm.xlu0 %4044, %v375_v55   ;;  %v383_v12 = vmul.f32 %v375_v55, %v347_v27  ;;  %v467_v27 = vld [vmem:[%s5452_s5 + $0x30] sm:$0xff]  ;;  %v4139_v55 = vld [vmem:[%s5451_s4 + $0x28] sm:$0xff]  }
  0xc0   : > { %v4199_v57 = vpop.eup %4198 }
  0xc1   : > { %v376_v59 = vmul.f32 %v4199_v57, %v372_v56  ;;  %v387_v15 = vsub.f32 %v379_v13, %v383_v12 }
  0xc3   : > { %v4201_v61 = vpop.eup %4200  ;;  %406 = vperm.xlu1 %4045, %v376_v59   ;;  %500 = vperm.xlu0 %4044, %v466_v58   ;;  %v384_v16 = vmul.f32 %v376_v59, %v348_v31 }
  0xc4   : > { %v373_v62 = vmul.f32 %v4201_v61, %v369_v60  ;;  %v4203_v3 = vpop.eup %4202 }
  0xc5   : > { %v374_v9 = vmul.f32 %v4203_v3, %v370_v7  ;;  %v388_v18 = vsub.f32 %v380_v17, %v384_v16 }
  0xc6   : > { %v381_v19 = vmul.f32 %v373_v62, %v345_v36 }
  0xc7   : > { %391 = vperm.xlu1 %4045, %v373_v62   ;;  %510 = vperm.xlu0 %4044, %v468_v63   ;;  %v382_v22 = vmul.f32 %v374_v9, %v346_v37 }
  0xc8   : > { %v385_v21 = vsub.f32 %v377_v20, %v381_v19 }
  0xc9   : > { %v386_v25 = vsub.f32 %v378_v23, %v382_v22 }
  0xcb   : > { %396 = vperm.xlu1 %4045, %v374_v9   ;;  %480 = vperm.xlu0 %4044, %v462_v8  }
  0xcf   : > { %429 = vperm.xlu1 %4045, %v387_v15   ;;  %490 = vperm.xlu0 %4044, %v464_v14  }
  0xd3   : > { %434 = vperm.xlu1 %4045, %v388_v18  }
  0xd7   : > { %419 = vperm.xlu1 %4045, %v385_v21  }
  0xdb   : > { %424 = vperm.xlu1 %4045, %v386_v25  }
  0xdf   : > { %495 = vperm.xlu1 %4045, %v465_v26  }
  0xe3   : > { %505 = vperm.xlu1 %4045, %v467_v27  }
  0xe7   : > { %475 = vperm.xlu1 %4045, %v461_v28  }
  0xeb   : > { %485 = vperm.xlu1 %4045, %v463_v29  }
 0x13a   : > { %v402_v33 = vpop.permute.xlu0 %401 }
 0x13b   : > { %v413_v35 = vmul.f32 %v402_v33, %v4500_v0  ;;  %v414_v36 = vmul.f32 %v402_v33, %v4503_v1 }
 0x13e   : > { %v407_v30 = vpop.permute.xlu1 %406  ;;  %v501_v57 = vpop.permute.xlu0 %500 }
 0x13f   : > { %v415_v37 = vmul.f32 %v407_v30, %v4514_v5  ;;  %v416_v38 = vmul.f32 %v407_v30, %v4517_v6 }
 0x142   : > { %v392_v31 = vpop.permute.xlu1 %391  ;;  %v511_v59 = vpop.permute.xlu0 %510 }
 0x143   : > { %v409_v47 = vmul.f32 %v392_v31, %v4526_v10  ;;  %v410_v0 = vmul.f32 %v392_v31, %v4529_v11  ;;  %v4137_v10 = vld [vmem:[%s5451_s4 + $0x18] sm:$0xff]   ;;  %v4138_v11 = vld [vmem:[%s5451_s4 + $0x20] sm:$0xff]  }
 0x146   : > { %v397_v32 = vpop.permute.xlu1 %396  ;;  %v481_v3 = vpop.permute.xlu0 %480 }
 0x147   : > { %v411_v1 = vmul.f32 %v397_v32, %v4506_v2  ;;  %v412_v5 = vmul.f32 %v397_v32, %v4511_v4  ;;  %v4135_v2 = vld [vmem:[%s5451_s4 + $0x8] sm:$0xff]   ;;  %v4136_v4 = vld [vmem:[%s5451_s4 + $0x10] sm:$0xff]  }
 0x14a   : > { %v430_v34 = vpop.permute.xlu1 %429  ;;  %v491_v15 = vpop.permute.xlu0 %490 }
 0x14b   : > { %v441_v40 = vadd.f32 %v430_v34, %v413_v35  ;;  %v442_v41 = vadd.f32 %v430_v34, %v414_v36 }
 0x14e   : > { %v435_v39 = vpop.permute.xlu1 %434 }
 0x14f   : > { %v443_v42 = vadd.f32 %v435_v39, %v415_v37  ;;  %v444_v43 = vadd.f32 %v435_v39, %v416_v38 }
 0x151   : > { %v448_v44 = vpack.c.bf16 %v444_v43, %v442_v41  ;;  %v447_v45 = vpack.c.bf16 %v443_v42, %v441_v40 }
 0x152   : > { %v420_v46 = vpop.permute.xlu1 %419 }
 0x153   : > { %594 = vmatprep.subr.bf16.mxu0 %v448_v44  ;;  %v437_v6 = vadd.f32 %v420_v46, %v409_v47  ;;  %v438_v49 = vadd.f32 %v420_v46, %v410_v0  ;;  %v469_v44 = vld [vmem:[%s5452_s5 + $0x40] sm:$0xff]  ;;  %v470_v46 = vld [vmem:[%s5452_s5 + $0x48] sm:$0xff]  ;;  %v471_v47 = vld [vmem:[%s5452_s5 + $0x50] sm:$0xff] }
 0x154   : > { %595 = vmatpush1.bf16.msra.mxu0 %v447_v45  ;;  %v472_v45 = vld [vmem:[%s5452_s5 + $0x58] sm:$0xff] }
 0x156   : > { %v425_v48 = vpop.permute.xlu1 %424 }
 0x157   : > { %v439_v50 = vadd.f32 %v425_v48, %v411_v1  ;;  %v440_v51 = vadd.f32 %v425_v48, %v412_v5 }
 0x159   : > { %v445_v52 = vpack.c.bf16 %v439_v50, %v437_v6  ;;  %v446_v53 = vpack.c.bf16 %v440_v51, %v438_v49 }
 0x15a   : > { %v496_v56 = vpop.permute.xlu1 %495 }
 0x15b   : > { %596 = vmatprep.subr.bf16.mxu0 %v446_v53 }
 0x15c   : > { %597 = vmatpush1.bf16.msra.mxu0 %v445_v52 }
 0x15e   : > { %v506_v58 = vpop.permute.xlu1 %505 }
 0x15f   : > { %3443 = vmatmul.mubr.msk.bf16.vlgmr.msra.gmra.mxu0 %vm563_vm0, %v4134_v54 }
 0x160   : > { %624 = vmatprep.mubr.bf16.mxu0 %v4394_v24 }
 0x162   : > { %v476_v60 = vpop.permute.xlu1 %475 }
 0x167   : > { %3444 = vmatmul.mubr.msk.bf16.gmra.mxu0 %vm563_vm0, %v4135_v2 }
 0x168   : > { %634 = vmatprep.mubr.bf16.mxu0 %v4394_v24 }
 0x16f   : > { %3445 = vmatmul.mubr.msk.bf16.gmra.mxu0 %vm563_vm0, %v4136_v4 }
 0x170   : > { %644 = vmatprep.mubr.bf16.mxu0 %v4394_v24 }
 0x177   : > { %3446 = vmatmul.mubr.msk.bf16.gmra.mxu0 %vm563_vm0, %v4137_v10 }
 0x178   : > { %654 = vmatprep.mubr.bf16.mxu0 %v4394_v24 }
 0x17f   : > { %3447 = vmatmul.mubr.msk.bf16.gmra.mxu0 %vm563_vm0, %v4138_v11 }
 0x180   : > { %664 = vmatprep.mubr.bf16.mxu0 %v4394_v24  ;;  %v486_v24 = vpop.permute.xlu1 %485 }
 0x187   : > { %3448 = vmatmul.mubr.msk.bf16.gmra.mxu0 %vm563_vm0, %v4139_v55 }
 0x21f   : > { %v616_v61 = vpop.f32.mrf.mxu0 }
 0x220   : > { %v617_v62 = vadd.f32 %v616_v61, %v476_v60 }
 0x221   : > { %v618_v63 = vpop.f32.mrf.mxu0 }
 0x222   : > { %675 = vxpose.xlu0.b32.start [1/4] (short) %v617_v62, 128  ;;  %v4635_v22 = vadd.f32 %v618_v63, %v476_v60 }
 0x223   : > { %v620_v7 = vpop.f32.mrf.mxu0 }
 0x224   : > { %v621_v8 = vadd.f32 %v620_v7, %v481_v3 }
 0x225   : > { %v622_v9 = vpop.f32.mrf.mxu0 }
 0x226   : > { %676 = vxpose.xlu0.b32.cont [2/4] (short) %v621_v8, 128  ;;  %v4641_v29 = vadd.f32 %v622_v9, %v481_v3 }
 0x227   : > { %v626_v12 = vpop.f32.mrf.mxu0 }
 0x228   : > { %v627_v13 = vadd.f32 %v626_v12, %v486_v24 }
 0x229   : > { %v628_v14 = vpop.f32.mrf.mxu0 }
 0x22a   : > { %677 = vxpose.xlu0.b32.cont [3/4] (short) %v627_v13, 128  ;;  %v4647_v35 = vadd.f32 %v628_v14, %v486_v24 }
 0x22b   : > { %v630_v16 = vpop.f32.mrf.mxu0 }
 0x22c   : > { %v631_v17 = vadd.f32 %v630_v16, %v491_v15 }
 0x22d   : > { %v632_v18 = vpop.f32.mrf.mxu0 }
 0x22e   : > { %678 = vxpose.xlu0.b32.end [4/4] (short) %v631_v17, 128  ;;  %v4653_v41 = vadd.f32 %v632_v18, %v491_v15 }
 0x22f   : > { %v636_v19 = vpop.f32.mrf.mxu0 }
 0x230   : > { %v637_v20 = vadd.f32 %v636_v19, %v496_v56 }
 0x231   : > { %v638_v21 = vpop.f32.mrf.mxu0 }
 0x232   : > { %v4637_v23 = vadd.f32 %v638_v21, %v496_v56  ;;  %900 = vxpose.xlu1.b32.start [1/4] (short) %v637_v20, 128 }
 0x233   : > { %v640_v25 = vpop.f32.mrf.mxu0 }
 0x234   : > { %v4046_v26 = vpack.i.bf16 %v4635_v22, %v4637_v23  ;;  %v641_v27 = vadd.f32 %v640_v25, %v501_v57 }
 0x235   : > { %v642_v28 = vpop.f32.mrf.mxu0 }
 0x236   : > { %v4643_v30 = vadd.f32 %v642_v28, %v501_v57  ;;  %901 = vxpose.xlu1.b32.cont [2/4] (short) %v641_v27, 128 }
 0x237   : > { %v646_v31 = vpop.f32.mrf.mxu0 }
 0x238   : > { %v4048_v32 = vpack.i.bf16 %v4641_v29, %v4643_v30  ;;  %v647_v33 = vadd.f32 %v646_v31, %v506_v58 }
 0x239   : > { %v648_v34 = vpop.f32.mrf.mxu0 }
 0x23a   : > { %v4649_v36 = vadd.f32 %v648_v34, %v506_v58  ;;  %902 = vxpose.xlu1.b32.cont [3/4] (short) %v647_v33, 128 }
 0x23b   : > { %v650_v37 = vpop.f32.mrf.mxu0 }
 0x23c   : > { %v4050_v38 = vpack.i.bf16 %v4647_v35, %v4649_v36  ;;  %v651_v39 = vadd.f32 %v650_v37, %v511_v59 }
 0x23d   : > { %v652_v40 = vpop.f32.mrf.mxu0 }
 0x23e   : > { %v4655_v42 = vadd.f32 %v652_v40, %v511_v59  ;;  %903 = vxpose.xlu1.b32.end [4/4] (short) %v651_v39, 128 }
 0x240   : > { %v4052_v43 = vpack.i.bf16 %v4653_v41, %v4655_v42 }
 0x287   : > { %515 = vperm.xlu0 %4044, %v469_v44  }
 0x28b   : > { %530 = vperm.xlu0 %4044, %v472_v45  }
 0x28c   : > { %520 = vperm.xlu1 %4045, %v470_v46  }
 0x290   : > { %525 = vperm.xlu1 %4045, %v471_v47  }
 0x29e   : > { %v691_v0 = vpop.trf.xlu0 }
 0x29f   : > { %v3647_v1 = vpack.c.bf16 %v691_v0, %v691_v0 }
 0x2a1   : > { %868 = vst.msk [vmem:[#allocation2] sm:$0xf] %vm867_vm1, %v3647_v1 }
 0x2a2   : > { %v692_v5 = vpop.trf.xlu0 }
 0x2a3   : > { %v3648_v48 = vpack.c.bf16 %v692_v5, %v692_v5 }
 0x2a5   : > { %869 = vst.msk [vmem:[#allocation2 + $0x4] sm:$0xf] %vm867_vm1, %v3648_v48 }
 0x2a6   : > { %v693_v6 = vpop.trf.xlu0 }
 0x2a7   : > { %v3649_v49 = vpack.c.bf16 %v693_v6, %v693_v6 }
 0x2a9   : > { %870 = vst.msk [vmem:[#allocation2 + $0x8] sm:$0xf] %vm867_vm1, %v3649_v49 }
 0x2aa   : > { %v694_v50 = vpop.trf.xlu0 }
 0x2ab   : > { %v3650_v51 = vpack.c.bf16 %v694_v50, %v694_v50 }
 0x2ac   : > { %v4144_v52 = vld [vmem:[#allocation2] sm:$0xff]  }
 0x2ad   : > { %871 = vst.msk [vmem:[#allocation2 + $0xc] sm:$0xf] %vm867_vm1, %v3650_v51  ;;  %3832 = vmatprep.mubr.msk.bf16.mxu1 %vm563_vm0, %v4144_v52 }
 0x2ae   : > { %v916_v53 = vpop.trf.xlu1  ;;  %v695_v54 = vpop.trf.xlu0 }
 0x2af   : > { %v3679_v2 = vpack.c.bf16 %v916_v53, %v916_v53  ;;  %v3651_v4 = vpack.c.bf16 %v695_v54, %v695_v54 }
 0x2b1   : > { %1092 = vst.msk [vmem:[#allocation3] sm:$0xf] %vm867_vm1, %v3679_v2  ;;  %872 = vst.msk [vmem:[#allocation2 + $0x10] sm:$0xf] %vm867_vm1, %v3651_v4 }
 0x2b2   : > { %v917_v10 = vpop.trf.xlu1  ;;  %v696_v11 = vpop.trf.xlu0 }
 0x2b3   : > { %v3680_v55 = vpack.c.bf16 %v917_v10, %v917_v10  ;;  %v3652_v56 = vpack.c.bf16 %v696_v11, %v696_v11 }
 0x2b5   : > { %1093 = vst.msk [vmem:[#allocation3 + $0x4] sm:$0xf] %vm867_vm1, %v3680_v55  ;;  %873 = vst.msk [vmem:[#allocation2 + $0x14] sm:$0xf] %vm867_vm1, %v3652_v56 }
 0x2b6   : > { %v918_v57 = vpop.trf.xlu1  ;;  %v697_v58 = vpop.trf.xlu0 }
 0x2b7   : > { %v3681_v59 = vpack.c.bf16 %v918_v57, %v918_v57  ;;  %v3653_v60 = vpack.c.bf16 %v697_v58, %v697_v58 }
 0x2b9   : > { %1094 = vst.msk [vmem:[#allocation3 + $0x8] sm:$0xf] %vm867_vm1, %v3681_v59  ;;  %874 = vst.msk [vmem:[#allocation2 + $0x18] sm:$0xf] %vm867_vm1, %v3653_v60 }
 0x2ba   : > { %v919_v61 = vpop.trf.xlu1  ;;  %v698_v62 = vpop.trf.xlu0 }
 0x2bb   : > { %v3682_v63 = vpack.c.bf16 %v919_v61, %v919_v61  ;;  %v3654_v3 = vpack.c.bf16 %v698_v62, %v698_v62  ;;  %v4145_v62 = vld [vmem:[#allocation2 + $0x8] sm:$0xff]  }
 0x2bc   : > { %v4143_v55 = vld [vmem:[#allocation3] sm:$0xff]   ;;  %v4146_v61 = vld [vmem:[#allocation2 + $0x10] sm:$0xff]  }
 0x2bd   : > { %1095 = vst.msk [vmem:[#allocation3 + $0xc] sm:$0xf] %vm867_vm1, %v3682_v63  ;;  %875 = vst.msk [vmem:[#allocation2 + $0x1c] sm:$0xf] %vm867_vm1, %v3654_v3  ;;  %v1425_v60 = vsel %vm563_vm0, %v4143_v55, 0 }
 0x2be   : > { %v920_v7 = vpop.trf.xlu1  ;;  %v699_v8 = vpop.trf.xlu0 }
 0x2bf   : > { %v3683_v9 = vpack.c.bf16 %v920_v7, %v920_v7  ;;  %v3655_v24 = vpack.c.bf16 %v699_v8, %v699_v8 }
 0x2c1   : > { %1096 = vst.msk [vmem:[#allocation3 + $0x10] sm:$0xf] %vm867_vm1, %v3683_v9  ;;  %876 = vst.msk [vmem:[#allocation2 + $0x20] sm:$0xf] %vm867_vm1, %v3655_v24 }
 0x2c2   : > { %v921_v12 = vpop.trf.xlu1  ;;  %v700_v13 = vpop.trf.xlu0 }
 0x2c3   : > { %v3684_v14 = vpack.c.bf16 %v921_v12, %v921_v12  ;;  %v3656_v15 = vpack.c.bf16 %v700_v13, %v700_v13 }
 0x2c4   : > { %v4142_v53 = vld [vmem:[#allocation3 + $0x8] sm:$0xff]   ;;  %v4147_v63 = vld [vmem:[#allocation2 + $0x18] sm:$0xff]  }
 0x2c5   : > { %1097 = vst.msk [vmem:[#allocation3 + $0x14] sm:$0xf] %vm867_vm1, %v3684_v14  ;;  %877 = vst.msk [vmem:[#allocation2 + $0x24] sm:$0xf] %vm867_vm1, %v3656_v15  ;;  %v1428_v11 = vsel %vm563_vm0, %v4142_v53, 0 }
 0x2c6   : > { %v922_v16 = vpop.trf.xlu1  ;;  %v701_v17 = vpop.trf.xlu0 }
 0x2c7   : > { %v3685_v18 = vpack.c.bf16 %v922_v16, %v922_v16  ;;  %v3657_v19 = vpack.c.bf16 %v701_v17, %v701_v17 }
 0x2c9   : > { %1098 = vst.msk [vmem:[#allocation3 + $0x18] sm:$0xf] %vm867_vm1, %v3685_v18  ;;  %878 = vst.msk [vmem:[#allocation2 + $0x28] sm:$0xf] %vm867_vm1, %v3657_v19 }
 0x2ca   : > { %v923_v20 = vpop.trf.xlu1  ;;  %v702_v21 = vpop.trf.xlu0 }
 0x2cb   : > { %v3686_v25 = vpack.c.bf16 %v923_v20, %v923_v20  ;;  %v3658_v27 = vpack.c.bf16 %v702_v21, %v702_v21 }
 0x2cc   : > { %v4141_v47 = vld [vmem:[#allocation3 + $0x10] sm:$0xff]  }
 0x2cd   : > { %1099 = vst.msk [vmem:[#allocation3 + $0x1c] sm:$0xf] %vm867_vm1, %v3686_v25  ;;  %879 = vst.msk [vmem:[#allocation2 + $0x2c] sm:$0xf] %vm867_vm1, %v3658_v27  ;;  %v1431_v52 = vsel %vm563_vm0, %v4141_v47, 0 }
 0x2ce   : > { %v924_v28 = vpop.trf.xlu1  ;;  %v703_v31 = vpop.trf.xlu0 }
 0x2cf   : > { %v3687_v33 = vpack.c.bf16 %v924_v28, %v924_v28  ;;  %v3659_v34 = vpack.c.bf16 %v703_v31, %v703_v31 }
 0x2d1   : > { %1100 = vst.msk [vmem:[#allocation3 + $0x20] sm:$0xf] %vm867_vm1, %v3687_v33  ;;  %880 = vst.msk [vmem:[#allocation2 + $0x30] sm:$0xf] %vm867_vm1, %v3659_v34 }
 0x2d2   : > { %v925_v37 = vpop.trf.xlu1  ;;  %v704_v39 = vpop.trf.xlu0 }
 0x2d3   : > { %v3688_v40 = vpack.c.bf16 %v925_v37, %v925_v37  ;;  %v3660_v44 = vpack.c.bf16 %v704_v39, %v704_v39 }
 0x2d4   : > { %v4140_v45 = vld [vmem:[#allocation3 + $0x18] sm:$0xff]   ;;  %v4157_v29 = vld [vmem:[#allocation2 + $0x28] sm:$0xff]  }
 0x2d5   : > { %1101 = vst.msk [vmem:[#allocation3 + $0x24] sm:$0xf] %vm867_vm1, %v3688_v40  ;;  %881 = vst.msk [vmem:[#allocation2 + $0x34] sm:$0xf] %vm867_vm1, %v3660_v44  ;;  %3984 = vmatprep.subr.msk.bf16.mxu1 %vm563_vm0, %v4140_v45  ;;  %v1434_v46 = vsel %vm563_vm0, %v4140_v45, 0  ;;  %v656_v44 = vpop.f32.mrf.mxu0 }
 0x2d6   : > { %v926_v0 = vpop.trf.xlu1  ;;  %v705_v1 = vpop.trf.xlu0  ;;  %3825 = vmatpush3.bf16.xpose.msra.mxu1 %v1434_v46 }
 0x2d7   : > { %v3689_v5 = vpack.c.bf16 %v926_v0, %v926_v0  ;;  %v3661_v48 = vpack.c.bf16 %v705_v1, %v705_v1  ;;  %3985 = vmatprep.subr.msk.bf16.mxu1 %vm563_vm0, %v4141_v47  ;;  %v4726_v45 = vpop.f32.mrf.mxu0 }
 0x2d9   : > { %1102 = vst.msk [vmem:[#allocation3 + $0x28] sm:$0xf] %vm867_vm1, %v3689_v5  ;;  %882 = vst.msk [vmem:[#allocation2 + $0x38] sm:$0xf] %vm867_vm1, %v3661_v48  ;;  %v660_v46 = vpop.f32.mrf.mxu0 }
 0x2da   : > { %v927_v6 = vpop.trf.xlu1  ;;  %v706_v49 = vpop.trf.xlu0 }
 0x2db   : > { %v3690_v50 = vpack.c.bf16 %v927_v6, %v927_v6  ;;  %v3662_v51 = vpack.c.bf16 %v706_v49, %v706_v49  ;;  %v4730_v0 = vpop.f32.mrf.mxu0 }
 0x2dc   : > { %v4156_v23 = vld [vmem:[#allocation3 + $0x20] sm:$0xff]   ;;  %v4158_v30 = vld [vmem:[#allocation2 + $0x30] sm:$0xff]  }
 0x2dd   : > { %1103 = vst.msk [vmem:[#allocation3 + $0x2c] sm:$0xf] %vm867_vm1, %v3690_v50  ;;  %883 = vst.msk [vmem:[#allocation2 + $0x3c] sm:$0xf] %vm867_vm1, %v3662_v51  ;;  %v666_v48 = vpop.f32.mrf.mxu0 }
 0x2de   : > { %v928_v54 = vpop.trf.xlu1  ;;  %3827 = vmatpush3.bf16.xpose.msra.mxu1 %v1431_v52 }
 0x2df   : > { %v3691_v2 = vpack.c.bf16 %v928_v54, %v928_v54  ;;  %3986 = vmatprep.subr.msk.bf16.mxu1 %vm563_vm0, %v4142_v53  ;;  %v4738_v50 = vpop.f32.mrf.mxu0 }
 0x2e1   : > { %1104 = vst.msk [vmem:[#allocation3 + $0x30] sm:$0xf] %vm867_vm1, %v3691_v2  ;;  %v670_v53 = vpop.f32.mrf.mxu0 }
 0x2e2   : > { %v929_v4 = vpop.trf.xlu1 }
 0x2e3   : > { %v3692_v10 = vpack.c.bf16 %v929_v4, %v929_v4 }
 0x2e5   : > { %1105 = vst.msk [vmem:[#allocation3 + $0x34] sm:$0xf] %vm867_vm1, %v3692_v10 }
 0x2e6   : > { %v930_v56 = vpop.trf.xlu1  ;;  %3829 = vmatpush3.bf16.xpose.msra.mxu1 %v1428_v11 }
 0x2e7   : > { %v3693_v57 = vpack.c.bf16 %v930_v56, %v930_v56  ;;  %3987 = vmatprep.subr.msk.bf16.mxu1 %vm563_vm0, %v4143_v55 }
 0x2e9   : > { %1106 = vst.msk [vmem:[#allocation3 + $0x38] sm:$0xf] %vm867_vm1, %v3693_v57 }
 0x2ea   : > { %v931_v58 = vpop.trf.xlu1 }
 0x2eb   : > { %v3694_v59 = vpack.c.bf16 %v931_v58, %v931_v58 }
 0x2ed   : > { %1107 = vst.msk [vmem:[#allocation3 + $0x3c] sm:$0xf] %vm867_vm1, %v3694_v59 }
 0x2ee   : > { %3831 = vmatpush3.bf16.xpose.msra.mxu1 %v1425_v60 }
 0x2f5   : > { %3833 = vmatmul.mubr.msk.bf16.vlgmr.msra.gmra.mxu1 %vm563_vm0, %v4145_v62 }
 0x2f6   : > { %3836 = vmatprep.mubr.msk.bf16.mxu1 %vm563_vm0, %v4146_v61 }
 0x2fd   : > { %3837 = vmatmul.mubr.msk.bf16.gmra.mxu1 %vm563_vm0, %v4147_v63 }
 0x302   : > { %v4728_v47 = vpop.permute.xlu0 %515 }
 0x303   : > { %v657_v5 = vadd.f32 %v656_v44, %v4728_v47 }
 0x306   : > { %v4741_v52 = vpop.permute.xlu0 %530 }
 0x307   : > { %v4732_v1 = vpop.permute.xlu1 %520  ;;  %v671_v54 = vadd.f32 %v670_v53, %v4741_v52 }
 0x308   : > { %v661_v6 = vadd.f32 %v660_v46, %v4732_v1 }
 0x30b   : > { %v4736_v49 = vpop.permute.xlu1 %525 }
 0x30c   : > { %v667_v51 = vadd.f32 %v666_v48, %v4736_v49 }
 0x3b5   : > { %v3834_v3 = vpop.f32.mrf.mxu1 }
 0x3b6   : > { %v1503_v7 = vmul.f32 0.17677669, %v3834_v3 }
 0x3b7   : > { %v1470_v8 = vpop.f32.mrf.mxu1 }
 0x3b8   : > { %v1501_v9 = vmul.f32 0.17677669, %v1470_v8  ;;  %v1516_v24 = vsel %vm1509_vm2, %v1503_v7, -inf }
 0x3b9   : > { %1517 = vmax.xlane.f32.xlu0 %v1516_v24  ;;  %v3835_v12 = vpop.f32.mrf.mxu1 }
 0x3ba   : > { %v1504_v13 = vmul.f32 0.17677669, %v3835_v12  ;;  %v1510_v14 = vsel %vm1509_vm2, %v1501_v9, -inf }
 0x3bb   : > { %1511 = vmax.xlane.f32.xlu1 %v1510_v14  ;;  %v1473_v15 = vpop.f32.mrf.mxu1 }
 0x3bc   : > { %v1502_v16 = vmul.f32 0.17677669, %v1473_v15  ;;  %v1519_v18 = vsel %vm1509_vm2, %v1504_v13, -inf }
 0x3bd   : > { %v3838_v17 = vpop.f32.mrf.mxu1 }
 0x3be   : > { %v1513_v19 = vsel %vm1509_vm2, %v1502_v16, -inf  ;;  %v1507_v20 = vmul.f32 0.17677669, %v3838_v17 }
 0x3bf   : > { %1520 = vmax.xlane.f32.xlu1 %v1519_v18  ;;  %1514 = vmax.xlane.f32.xlu0 %v1513_v19  ;;  %v1486_v21 = vpop.f32.mrf.mxu1 }
 0x3c0   : > { %v1528_v25 = vsel %vm1509_vm2, %v1507_v20, -inf  ;;  %v1505_v27 = vmul.f32 0.17677669, %v1486_v21 }
 0x3c1   : > { %v3839_v28 = vpop.f32.mrf.mxu1 }
 0x3c2   : > { %v1522_v33 = vsel %vm1509_vm2, %v1505_v27, -inf  ;;  %v1508_v37 = vmul.f32 0.17677669, %v3839_v28 }
 0x3c3   : > { %1529 = vmax.xlane.f32.xlu1 %v1528_v25  ;;  %v1489_v31 = vpop.f32.mrf.mxu1 }
 0x3c4   : > { %v4721_v34 = vmul.f32 0.17677669, %v1489_v31  ;;  %v1531_v40 = vsel %vm1509_vm2, %v1508_v37, -inf }
 0x3c6   : > { %v1525_v39 = vsel %vm1509_vm2, %v4721_v34, -inf }
 0x3c7   : > { %1523 = vmax.xlane.f32.xlu1 %v1522_v33 }
 0x3cb   : > { %1526 = vmax.xlane.f32.xlu1 %v1525_v39 }
 0x3cf   : > { %1532 = vmax.xlane.f32.xlu1 %v1531_v40 }
 0x3ec   : > { %1124 = vxpose.xlu0.b32.start [1/4] (short) %v657_v5, 128 }
 0x3f0   : > { %1125 = vxpose.xlu0.b32.cont [2/4] (short) %v661_v6, 128 }
 0x3f4   : > { %1126 = vxpose.xlu0.b32.cont [3/4] (short) %v667_v51, 128 }
 0x3f8   : > { %1127 = vxpose.xlu0.b32.end [4/4] (short) %v671_v54, 128 }
 0x442   : > { %v1518_v2 = vpop.xlane.xlu0 %1517 }
 0x443   : > { %v1536_v4 = vsub.f32 %v1503_v7, %v1518_v2 }
 0x444   : > { %v1512_v10 = vpop.xlane.xlu1 %1511 }
 0x445   : > { %v1546_v11 = vmul.f32 1.442695, %v1536_v4  ;;  %v1534_v55 = vsub.f32 %v1501_v9, %v1512_v10 }
 0x447   : > { %4204 = vpow2.f32 %v1546_v11  ;;  %v1542_v56 = vmul.f32 1.442695, %v1534_v55 }
 0x448   : > { %v1521_v57 = vpop.xlane.xlu1 %1520  ;;  %v1515_v58 = vpop.xlane.xlu0 %1514 }
 0x449   : > { %4206 = vpow2.f32 %v1542_v56  ;;  %v1537_v59 = vsub.f32 %v1504_v13, %v1521_v57  ;;  %v1535_v60 = vsub.f32 %v1502_v16, %v1515_v58 }
 0x44b   : > { %v1548_v61 = vmul.f32 1.442695, %v1537_v59  ;;  %v1544_v62 = vmul.f32 1.442695, %v1535_v60 }
 0x44c   : > { %v1530_v63 = vpop.xlane.xlu1 %1529 }
 0x44d   : > { %4208 = vpow2.f32 %v1548_v61  ;;  %v1540_v3 = vsub.f32 %v1507_v20, %v1530_v63 }
 0x44e   : > { %4210 = vpow2.f32 %v1544_v62 }
 0x44f   : > { %v1554_v24 = vmul.f32 1.442695, %v1540_v3 }
 0x450   : > { %v1524_v8 = vpop.xlane.xlu1 %1523 }
 0x451   : > { %v1538_v12 = vsub.f32 %v1505_v27, %v1524_v8  ;;  %4212 = vpow2.f32 %v1554_v24 }
 0x453   : > { %v1550_v9 = vmul.f32 1.442695, %v1538_v12 }
 0x454   : > { %v4744_v7 = vpop.eup %4204  ;;  %v1527_v14 = vpop.xlane.xlu1 %1526 }
 0x455   : > { %v1564_v15 = vsel %vm1509_vm2, %v4744_v7, 0.0  ;;  %4214 = vpow2.f32 %v1550_v9  ;;  %v1539_v16 = vsub.f32 %v4721_v34, %v1527_v14  ;;  %v4152_v9 = vld [vmem:[#allocation3 + $0x38] sm:$0xff]  }
 0x456   : > { %v4207_v17 = vpop.eup %4206  ;;  %1565 = vadd.xlane.f32.xlu1 %v1564_v15 }
 0x457   : > { %v1558_v19 = vsel %vm1509_vm2, %v4207_v17, 0.0  ;;  %v1552_v31 = vmul.f32 1.442695, %v1539_v16 }
 0x458   : > { %v1533_v13 = vpop.xlane.xlu1 %1532 }
 0x459   : > { %v1541_v18 = vsub.f32 %v1508_v37, %v1533_v13  ;;  %v4153_v13 = vld [vmem:[#allocation3 + $0x30] sm:$0xff]  }
 0x45a   : > { %v4750_v20 = vpop.eup %4208  ;;  %1559 = vadd.xlane.f32.xlu1 %v1558_v19  ;;  %v1925_v16 = vsel %vm563_vm0, %v4153_v13, 0 }
 0x45b   : > { %v4211_v21 = vpop.eup %4210  ;;  %v1583_v25 = vpack.c.bf16 %v4750_v20, %v4744_v7  ;;  %v1556_v27 = vmul.f32 1.442695, %v1541_v18  ;;  %v1567_v33 = vsel %vm1509_vm2, %v4750_v20, 0.0  ;;  %v4154_v18 = vld [vmem:[#allocation2 + $0x20] sm:$0xff]   ;;  %v4155_v7 = vld [vmem:[#allocation3 + $0x28] sm:$0xff]  }
 0x45c   : > { %v1582_v28 = vpack.c.bf16 %v4211_v21, %v4207_v17  ;;  %v1561_v34 = vsel %vm1509_vm2, %v4211_v21, 0.0  ;;  %v1928_v17 = vsel %vm563_vm0, %v4152_v9, 0  ;;  %v1922_v22 = vsel %vm563_vm0, %v4155_v7, 0 }
 0x45d   : > { %4216 = vpow2.f32 %v1556_v27 }
 0x45e   : > { %3848 = vmatprep.mubr.msk.bf16.mxu1 %vm1509_vm2, %v1582_v28  ;;  %1568 = vadd.xlane.f32.xlu1 %v1567_v33  ;;  %4218 = vpow2.f32 %v1552_v31  ;;  %v4213_v37 = vpop.eup %4212 }
 0x45f   : > { %v1576_v39 = vsel %vm1509_vm2, %v4213_v37, 0.0 }
 0x462   : > { %1562 = vadd.xlane.f32.xlu1 %v1561_v34  ;;  %v4215_v40 = vpop.eup %4214 }
 0x463   : > { %v1570_v5 = vsel %vm1509_vm2, %v4215_v40, 0.0 }
 0x466   : > { %1577 = vadd.xlane.f32.xlu1 %v1576_v39 }
 0x468   : > { %v1140_v44 = vpop.trf.xlu0 }
 0x469   : > { %v3711_v46 = vpack.c.bf16 %v1140_v44, %v1140_v44 }
 0x46a   : > { %v4217_v48 = vpop.eup %4216  ;;  %1571 = vadd.xlane.f32.xlu1 %v1570_v5 }
 0x46b   : > { %1316 = vst.msk [vmem:[#allocation4] sm:$0xf] %vm867_vm1, %v3711_v46  ;;  %v1585_v6 = vpack.c.bf16 %v4217_v48, %v4213_v37  ;;  %v1579_v54 = vsel %vm1509_vm2, %v4217_v48, 0.0  ;;  %v4219_v2 = vpop.eup %4218 }
 0x46c   : > { %v1141_v51 = vpop.trf.xlu0  ;;  %v1573_v11 = vsel %vm1509_vm2, %v4219_v2, 0.0  ;;  %v1584_v15 = vpack.c.bf16 %v4219_v2, %v4215_v40 }
 0x46d   : > { %v3712_v53 = vpack.c.bf16 %v1141_v51, %v1141_v51 }
 0x46e   : > { %1580 = vadd.xlane.f32.xlu1 %v1579_v54 }
 0x46f   : > { %1317 = vst.msk [vmem:[#allocation4 + $0x4] sm:$0xf] %vm867_vm1, %v3712_v53 }
 0x470   : > { %v1142_v4 = vpop.trf.xlu0 }
 0x471   : > { %v3713_v10 = vpack.c.bf16 %v1142_v4, %v1142_v4 }
 0x472   : > { %1574 = vadd.xlane.f32.xlu1 %v1573_v11 }
 0x473   : > { %1318 = vst.msk [vmem:[#allocation4 + $0x8] sm:$0xf] %vm867_vm1, %v3713_v10 }
 0x474   : > { %v1143_v55 = vpop.trf.xlu0 }
 0x475   : > { %v3714_v56 = vpack.c.bf16 %v1143_v55, %v1143_v55 }
 0x476   : > { %v4151_v14 = vld [vmem:[#allocation4] sm:$0xff]  }
 0x477   : > { %1319 = vst.msk [vmem:[#allocation4 + $0xc] sm:$0xf] %vm867_vm1, %v3714_v56 }
 0x478   : > { %v1144_v57 = vpop.trf.xlu0 }
 0x479   : > { %v3715_v58 = vpack.c.bf16 %v1144_v57, %v1144_v57 }
 0x47b   : > { %1320 = vst.msk [vmem:[#allocation4 + $0x10] sm:$0xf] %vm867_vm1, %v3715_v58 }
 0x47c   : > { %v1145_v59 = vpop.trf.xlu0 }
 0x47d   : > { %v3716_v60 = vpack.c.bf16 %v1145_v59, %v1145_v59 }
 0x47e   : > { %v4150_v12 = vld [vmem:[#allocation4 + $0x8] sm:$0xff]  }
 0x47f   : > { %1321 = vst.msk [vmem:[#allocation4 + $0x14] sm:$0xf] %vm867_vm1, %v3716_v60 }
 0x480   : > { %v1146_v61 = vpop.trf.xlu0 }
 0x481   : > { %v3717_v62 = vpack.c.bf16 %v1146_v61, %v1146_v61 }
 0x483   : > { %1322 = vst.msk [vmem:[#allocation4 + $0x18] sm:$0xf] %vm867_vm1, %v3717_v62 }
 0x484   : > { %v1147_v63 = vpop.trf.xlu0 }
 0x485   : > { %v3718_v3 = vpack.c.bf16 %v1147_v63, %v1147_v63 }
 0x486   : > { %v4149_v24 = vld [vmem:[#allocation4 + $0x10] sm:$0xff]  }
 0x487   : > { %1323 = vst.msk [vmem:[#allocation4 + $0x1c] sm:$0xf] %vm867_vm1, %v3718_v3 }
 0x48e   : > { %v4148_v8 = vld [vmem:[#allocation4 + $0x18] sm:$0xff]  }
 0x48f   : > { %3840 = vmatprep.subr.bf16.mxu1 %v4148_v8 }
 0x490   : > { %3841 = vmatpush3.bf16.msra.mxu1 %v4148_v8 }
 0x491   : > { %3842 = vmatprep.subr.bf16.mxu1 %v4149_v24 }
 0x494   : > { %3843 = vmatpush3.bf16.msra.mxu1 %v4149_v24 }
 0x495   : > { %3844 = vmatprep.subr.bf16.mxu1 %v4150_v12 }
 0x498   : > { %3845 = vmatpush3.bf16.msra.mxu1 %v4150_v12 }
 0x499   : > { %3846 = vmatprep.subr.bf16.mxu1 %v4151_v14 }
 0x49c   : > { %3847 = vmatpush3.bf16.msra.mxu1 %v4151_v14 }
 0x49d   : > { %3988 = vmatprep.subr.msk.bf16.mxu1 %vm563_vm0, %v4152_v9 }
 0x49f   : > { %3849 = vmatmul.mubr.msk.bf16.vlgmr.msra.gmra.mxu1 %vm1509_vm2, %v1583_v25 }
 0x4a0   : > { %3852 = vmatprep.mubr.msk.bf16.mxu1 %vm1509_vm2, %v1584_v15  ;;  %3865 = vmatpush3.bf16.xpose.msra.mxu1 %v1928_v17 }
 0x4a1   : > { %3989 = vmatprep.subr.msk.bf16.mxu1 %vm563_vm0, %v4153_v13 }
 0x4a5   : > { %4047 = vxpose.xlu1.b32.start [1/4] (short) %v4046_v26, 128  ;;  %v1919_v26 = vsel %vm563_vm0, %v4156_v23, 0 }
 0x4a7   : > { %3853 = vmatmul.mubr.msk.bf16.gmra.mxu1 %vm1509_vm2, %v1585_v6 }
 0x4a8   : > { %3867 = vmatpush3.bf16.xpose.msra.mxu1 %v1925_v16  ;;  %3872 = vmatprep.mubr.msk.bf16.mxu1 %vm563_vm0, %v4154_v18 }
 0x4a9   : > { %4049 = vxpose.xlu1.b32.cont [2/4] (short) %v4048_v32, 128  ;;  %3990 = vmatprep.subr.msk.bf16.mxu1 %vm563_vm0, %v4155_v7  ;;  %v4159_v32 = vld [vmem:[#allocation2 + $0x38] sm:$0xff]  }
 0x4ad   : > { %4051 = vxpose.xlu1.b32.cont [3/4] (short) %v4050_v38, 128 }
 0x4b0   : > { %3869 = vmatpush3.bf16.xpose.msra.mxu1 %v1922_v22 }
 0x4b1   : > { %4053 = vxpose.xlu1.b32.end [4/4] (short) %v4052_v43, 128  ;;  %3991 = vmatprep.subr.msk.bf16.mxu1 %vm563_vm0, %v4156_v23 }
 0x4b8   : > { %3871 = vmatpush3.bf16.xpose.msra.mxu1 %v1919_v26 }
 0x4bf   : > { %3873 = vmatmul.mubr.msk.bf16.vlgmr.msra.gmra.mxu1 %vm563_vm0, %v4157_v29 }
 0x4c0   : > { %3876 = vmatprep.mubr.msk.bf16.mxu1 %vm563_vm0, %v4158_v30 }
 0x4c7   : > { %3877 = vmatmul.mubr.msk.bf16.gmra.mxu1 %vm563_vm0, %v4159_v32 }
 0x4df   : > { %v4800_v35 = vpop.xlane.xlu1 %1565 }
 0x4e0   : > { %4220 = vrcp.f32 %v4800_v35 }
 0x4e3   : > { %v4802_v36 = vpop.xlane.xlu1 %1559 }
 0x4e4   : > { %4222 = vrcp.f32 %v4802_v36 }
 0x4e7   : > { %v4804_v38 = vpop.xlane.xlu1 %1568 }
 0x4e8   : > { %4224 = vrcp.f32 %v4804_v38 }
 0x4eb   : > { %v4806_v41 = vpop.xlane.xlu1 %1562 }
 0x4ec   : > { %4226 = vrcp.f32 %v4806_v41 }
 0x4ed   : > { %v4221_v32 = vpop.eup %4220 }
 0x4ef   : > { %v4808_v42 = vpop.xlane.xlu1 %1577 }
 0x4f0   : > { %4228 = vrcp.f32 %v4808_v42 }
 0x4f3   : > { %v4810_v43 = vpop.xlane.xlu1 %1571 }
 0x4f4   : > { %4230 = vrcp.f32 %v4810_v43 }
 0x4f7   : > { %v4812_v19 = vpop.xlane.xlu1 %1580 }
 0x4fb   : > { %v4814_v20 = vpop.xlane.xlu1 %1574 }
 0x4fc   : > { %4232 = vrcp.f32 %v4814_v20 }
 0x4fd   : > { %4234 = vrcp.f32 %v4812_v19 }
 0x521   : > { %v4054_v21 = vpop.trf.xlu1 }
 0x522   : > { %v4058_v25 = vunpack.i.h.bf16 %v4054_v21  ;;  %v4055_v27 = vunpack.i.l.bf16 %v4054_v21 }
 0x524   : > { %v3663_v28 = vpack.c.bf16 %v4058_v25, %v4058_v25  ;;  %v3695_v31 = vpack.c.bf16 %v4055_v27, %v4055_v27  ;;  %v4223_v25 = vpop.eup %4222 }
 0x525   : > { %v4059_v33 = vpop.trf.xlu1  ;;  %v4225_v41 = vpop.eup %4224 }
 0x526   : > { %884 = vst.msk [vmem:[#allocation2 + $0x40] sm:$0xf] %vm867_vm1, %v3663_v28  ;;  %1108 = vst.msk [vmem:[#allocation3 + $0x40] sm:$0xf] %vm867_vm1, %v3695_v31  ;;  %v4063_v34 = vunpack.i.h.bf16 %v4059_v33  ;;  %v4060_v37 = vunpack.i.l.bf16 %v4059_v33  ;;  %v4227_v42 = vpop.eup %4226 }
 0x528   : > { %v3664_v39 = vpack.c.bf16 %v4063_v34, %v4063_v34  ;;  %v3696_v40 = vpack.c.bf16 %v4060_v37, %v4060_v37  ;;  %v1148_v37 = vpop.trf.xlu0 }
 0x529   : > { %v4064_v44 = vpop.trf.xlu1 }
 0x52a   : > { %885 = vst.msk [vmem:[#allocation2 + $0x44] sm:$0xf] %vm867_vm1, %v3664_v39  ;;  %1109 = vst.msk [vmem:[#allocation3 + $0x44] sm:$0xf] %vm867_vm1, %v3696_v40  ;;  %v4068_v46 = vunpack.i.h.bf16 %v4064_v44  ;;  %v4065_v5 = vunpack.i.l.bf16 %v4064_v44  ;;  %v4229_v40 = vpop.eup %4228 }
 0x52c   : > { %v3665_v48 = vpack.c.bf16 %v4068_v46, %v4068_v46  ;;  %v3697_v6 = vpack.c.bf16 %v4065_v5, %v4065_v5  ;;  %v3719_v5 = vpack.c.bf16 %v1148_v37, %v1148_v37 }
 0x52d   : > { %v4069_v51 = vpop.trf.xlu1 }
 0x52e   : > { %886 = vst.msk [vmem:[#allocation2 + $0x48] sm:$0xf] %vm867_vm1, %v3665_v48  ;;  %1110 = vst.msk [vmem:[#allocation3 + $0x48] sm:$0xf] %vm867_vm1, %v3697_v6  ;;  %v4073_v53 = vunpack.i.h.bf16 %v4069_v51  ;;  %v4070_v54 = vunpack.i.l.bf16 %v4069_v51 }
 0x52f   : > { %1324 = vst.msk [vmem:[#allocation4 + $0x20] sm:$0xf] %vm867_vm1, %v3719_v5 }
 0x530   : > { %v3666_v2 = vpack.c.bf16 %v4073_v53, %v4073_v53  ;;  %v3698_v4 = vpack.c.bf16 %v4070_v54, %v4070_v54  ;;  %v4231_v53 = vpop.eup %4230 }
 0x531   : > { %v4074_v10 = vpop.trf.xlu1  ;;  %v4164_v56 = vld [vmem:[#allocation2 + $0x40] sm:$0xff]  }
 0x532   : > { %887 = vst.msk [vmem:[#allocation2 + $0x4c] sm:$0xf] %vm867_vm1, %v3666_v2  ;;  %1111 = vst.msk [vmem:[#allocation3 + $0x4c] sm:$0xf] %vm867_vm1, %v3698_v4  ;;  %v4078_v11 = vunpack.i.h.bf16 %v4074_v10  ;;  %v4075_v55 = vunpack.i.l.bf16 %v4074_v10  ;;  %3912 = vmatprep.mubr.msk.bf16.mxu1 %vm563_vm0, %v4164_v56  ;;  %v4163_v30 = vld [vmem:[#allocation3 + $0x40] sm:$0xff]  }
 0x533   : > { %v2429_v36 = vsel %vm563_vm0, %v4163_v30, 0 }
 0x534   : > { %v3667_v57 = vpack.c.bf16 %v4078_v11, %v4078_v11  ;;  %v3699_v58 = vpack.c.bf16 %v4075_v55, %v4075_v55  ;;  %v1149_v11 = vpop.trf.xlu0 }
 0x535   : > { %v4079_v59 = vpop.trf.xlu1  ;;  %v3720_v56 = vpack.c.bf16 %v1149_v11, %v1149_v11 }
 0x536   : > { %888 = vst.msk [vmem:[#allocation2 + $0x50] sm:$0xf] %vm867_vm1, %v3667_v57  ;;  %1112 = vst.msk [vmem:[#allocation3 + $0x50] sm:$0xf] %vm867_vm1, %v3699_v58  ;;  %v4083_v60 = vunpack.i.h.bf16 %v4079_v59  ;;  %v4080_v61 = vunpack.i.l.bf16 %v4079_v59 }
 0x537   : > { %1325 = vst.msk [vmem:[#allocation4 + $0x24] sm:$0xf] %vm867_vm1, %v3720_v56 }
 0x538   : > { %v3668_v62 = vpack.c.bf16 %v4083_v60, %v4083_v60  ;;  %v3700_v63 = vpack.c.bf16 %v4080_v61, %v4080_v61 }
 0x539   : > { %v4084_v3 = vpop.trf.xlu1  ;;  %v4162_v26 = vld [vmem:[#allocation3 + $0x48] sm:$0xff]  }
 0x53a   : > { %889 = vst.msk [vmem:[#allocation2 + $0x54] sm:$0xf] %vm867_vm1, %v3668_v62  ;;  %1113 = vst.msk [vmem:[#allocation3 + $0x54] sm:$0xf] %vm867_vm1, %v3700_v63  ;;  %v4088_v8 = vunpack.i.h.bf16 %v4084_v3  ;;  %v4085_v24 = vunpack.i.l.bf16 %v4084_v3  ;;  %v2432_v29 = vsel %vm563_vm0, %v4162_v26, 0  ;;  %v4165_v34 = vld [vmem:[#allocation2 + $0x48] sm:$0xff]   ;;  %v1150_v62 = vpop.trf.xlu0 }
 0x53b   : > { %v3721_v3 = vpack.c.bf16 %v1150_v62, %v1150_v62 }
 0x53c   : > { %v3669_v12 = vpack.c.bf16 %v4088_v8, %v4088_v8  ;;  %v3701_v14 = vpack.c.bf16 %v4085_v24, %v4085_v24 }
 0x53d   : > { %v4089_v9 = vpop.trf.xlu1  ;;  %1326 = vst.msk [vmem:[#allocation4 + $0x28] sm:$0xf] %vm867_vm1, %v3721_v3 }
 0x53e   : > { %890 = vst.msk [vmem:[#allocation2 + $0x58] sm:$0xf] %vm867_vm1, %v3669_v12  ;;  %1114 = vst.msk [vmem:[#allocation3 + $0x58] sm:$0xf] %vm867_vm1, %v3701_v14  ;;  %v4093_v15 = vunpack.i.h.bf16 %v4089_v9  ;;  %v4090_v17 = vunpack.i.l.bf16 %v4089_v9  ;;  %v1151_v9 = vpop.trf.xlu0 }
 0x540   : > { %v3670_v13 = vpack.c.bf16 %v4093_v15, %v4093_v15  ;;  %v3702_v16 = vpack.c.bf16 %v4090_v17, %v4090_v17  ;;  %v3722_v17 = vpack.c.bf16 %v1151_v9, %v1151_v9 }
 0x541   : > { %v4161_v18 = vld [vmem:[#allocation3 + $0x50] sm:$0xff]   ;;  %v4094_v39 = vpop.trf.xlu1 }
 0x542   : > { %891 = vst.msk [vmem:[#allocation2 + $0x5c] sm:$0xf] %vm867_vm1, %v3670_v13  ;;  %1115 = vst.msk [vmem:[#allocation3 + $0x5c] sm:$0xf] %vm867_vm1, %v3702_v16  ;;  %v2435_v23 = vsel %vm563_vm0, %v4161_v18, 0  ;;  %v4166_v46 = vld [vmem:[#allocation2 + $0x50] sm:$0xff]   ;;  %v4098_v48 = vunpack.i.h.bf16 %v4094_v39  ;;  %v4095_v51 = vunpack.i.l.bf16 %v4094_v39 }
 0x543   : > { %1327 = vst.msk [vmem:[#allocation4 + $0x2c] sm:$0xf] %vm867_vm1, %v3722_v17 }
 0x544   : > { %v3671_v2 = vpack.c.bf16 %v4098_v48, %v4098_v48  ;;  %v3703_v10 = vpack.c.bf16 %v4095_v51, %v4095_v51 }
 0x545   : > { %v4099_v55 = vpop.trf.xlu1 }
 0x546   : > { %892 = vst.msk [vmem:[#allocation2 + $0x60] sm:$0xf] %vm867_vm1, %v3671_v2  ;;  %v4103_v57 = vunpack.i.h.bf16 %v4099_v55  ;;  %1116 = vst.msk [vmem:[#allocation3 + $0x60] sm:$0xf] %vm867_vm1, %v3703_v10  ;;  %v4100_v58 = vunpack.i.l.bf16 %v4099_v55 }
 0x548   : > { %v3672_v59 = vpack.c.bf16 %v4103_v57, %v4103_v57  ;;  %v3704_v61 = vpack.c.bf16 %v4100_v58, %v4100_v58 }
 0x549   : > { %v4160_v7 = vld [vmem:[#allocation3 + $0x58] sm:$0xff]   ;;  %v4104_v63 = vpop.trf.xlu1 }
 0x54a   : > { %3992 = vmatprep.subr.msk.bf16.mxu1 %vm563_vm0, %v4160_v7  ;;  %v2438_v22 = vsel %vm563_vm0, %v4160_v7, 0  ;;  %v4167_v60 = vld [vmem:[#allocation2 + $0x58] sm:$0xff]   ;;  %893 = vst.msk [vmem:[#allocation2 + $0x64] sm:$0xf] %vm867_vm1, %v3672_v59  ;;  %v4108_v8 = vunpack.i.h.bf16 %v4104_v63  ;;  %1117 = vst.msk [vmem:[#allocation3 + $0x64] sm:$0xf] %vm867_vm1, %v3704_v61  ;;  %v4105_v24 = vunpack.i.l.bf16 %v4104_v63 }
 0x54b   : > { %3905 = vmatpush3.bf16.xpose.msra.mxu1 %v2438_v22  ;;  %v1152_v22 = vpop.trf.xlu0 }
 0x54c   : > { %3993 = vmatprep.subr.msk.bf16.mxu1 %vm563_vm0, %v4161_v18  ;;  %v3673_v12 = vpack.c.bf16 %v4108_v8, %v4108_v8  ;;  %v3705_v14 = vpack.c.bf16 %v4105_v24, %v4105_v24 }
 0x54d   : > { %v4109_v15 = vpop.trf.xlu1 }
 0x54e   : > { %894 = vst.msk [vmem:[#allocation2 + $0x68] sm:$0xf] %vm867_vm1, %v3673_v12  ;;  %v4113_v13 = vunpack.i.h.bf16 %v4109_v15  ;;  %1118 = vst.msk [vmem:[#allocation3 + $0x68] sm:$0xf] %vm867_vm1, %v3705_v14  ;;  %v4110_v16 = vunpack.i.l.bf16 %v4109_v15 }
 0x550   : > { %v3674_v18 = vpack.c.bf16 %v4113_v13, %v4113_v13  ;;  %v3706_v7 = vpack.c.bf16 %v4110_v16, %v4110_v16 }
 0x552   : > { %895 = vst.msk [vmem:[#allocation2 + $0x6c] sm:$0xf] %vm867_vm1, %v3674_v18  ;;  %1119 = vst.msk [vmem:[#allocation3 + $0x6c] sm:$0xf] %vm867_vm1, %v3706_v7 }
 0x553   : > { %3907 = vmatpush3.bf16.xpose.msra.mxu1 %v2435_v23  ;;  %v4114_v23 = vpop.trf.xlu1 }
 0x554   : > { %3994 = vmatprep.subr.msk.bf16.mxu1 %vm563_vm0, %v4162_v26  ;;  %v3723_v26 = vpack.c.bf16 %v1152_v22, %v1152_v22 }
 0x556   : > { %1328 = vst.msk [vmem:[#allocation4 + $0x30] sm:$0xf] %vm867_vm1, %v3723_v26 }
 0x55b   : > { %3909 = vmatpush3.bf16.xpose.msra.mxu1 %v2432_v29  ;;  %v4118_v29 = vunpack.i.h.bf16 %v4114_v23 }
 0x55c   : > { %3995 = vmatprep.subr.msk.bf16.mxu1 %vm563_vm0, %v4163_v30  ;;  %v4115_v30 = vunpack.i.l.bf16 %v4114_v23 }
 0x55f   : > { %v3850_v35 = vpop.f32.mrf.mxu1 }
 0x560   : > { %v4846_v21 = vmul.f32 %v4221_v32, %v3850_v35  ;;  %v3675_v35 = vpack.c.bf16 %v4118_v29, %v4118_v29 }
 0x561   : > { %v1656_v38 = vpop.f32.mrf.mxu1 }
 0x562   : > { %v4849_v27 = vmul.f32 %v4223_v25, %v1656_v38  ;;  %v1153_v25 = vpop.trf.xlu0  ;;  %v4119_v38 = vpop.trf.xlu1  ;;  %896 = vst.msk [vmem:[#allocation2 + $0x70] sm:$0xf] %vm867_vm1, %v3675_v35 }
 0x563   : > { %v3851_v28 = vpop.f32.mrf.mxu1  ;;  %3911 = vmatpush3.bf16.xpose.msra.mxu1 %v2429_v36  ;;  %v3707_v36 = vpack.c.bf16 %v4115_v30, %v4115_v30 }
 0x564   : > { %v4851_v31 = vmul.f32 %v4225_v41, %v3851_v28  ;;  %v3724_v41 = vpack.c.bf16 %v1153_v25, %v1153_v25  ;;  %v4123_v28 = vunpack.i.h.bf16 %v4119_v38 }
 0x565   : > { %v1659_v33 = vpop.f32.mrf.mxu1  ;;  %1120 = vst.msk [vmem:[#allocation3 + $0x70] sm:$0xf] %vm867_vm1, %v3707_v36 }
 0x566   : > { %v4853_v43 = vmul.f32 %v4227_v42, %v1659_v33  ;;  %v4120_v42 = vunpack.i.l.bf16 %v4119_v38  ;;  %1329 = vst.msk [vmem:[#allocation4 + $0x34] sm:$0xf] %vm867_vm1, %v3724_v41  ;;  %v1154_v39 = vpop.trf.xlu0  ;;  %v4170_v41 = vld [vmem:[#allocation3 + $0x68] sm:$0xff]  }
 0x567   : > { %v3854_v44 = vpop.f32.mrf.mxu1 }
 0x568   : > { %v4855_v6 = vmul.f32 %v4229_v40, %v3854_v44  ;;  %v3708_v37 = vpack.c.bf16 %v4120_v42, %v4120_v42  ;;  %v4124_v40 = vpop.trf.xlu1  ;;  %v4171_v42 = vld [vmem:[#allocation3 + $0x60] sm:$0xff]  }
 0x569   : > { %v1672_v54 = vpop.f32.mrf.mxu1  ;;  %v4128_v5 = vunpack.i.h.bf16 %v4124_v40  ;;  %v4125_v48 = vunpack.i.l.bf16 %v4124_v40 }
 0x56a   : > { %v4858_v4 = vmul.f32 %v4231_v53, %v1672_v54  ;;  %3913 = vmatmul.mubr.msk.bf16.vlgmr.msra.gmra.mxu1 %vm563_vm0, %v4165_v34  ;;  %v3676_v34 = vpack.c.bf16 %v4123_v28, %v4123_v28  ;;  %1121 = vst.msk [vmem:[#allocation3 + $0x74] sm:$0xf] %vm867_vm1, %v3708_v37  ;;  %v1155_v10 = vpop.trf.xlu0  ;;  %v2925_v28 = vsel %vm563_vm0, %v4170_v41, 0  ;;  %v4172_v37 = vld [vmem:[#allocation2 + $0x60] sm:$0xff]  }
 0x56b   : > { %3916 = vmatprep.mubr.msk.bf16.mxu1 %vm563_vm0, %v4166_v46  ;;  %v4874_v32 = vpop.f32.mrf.mxu1  ;;  %v3725_v46 = vpack.c.bf16 %v1154_v39, %v1154_v39  ;;  %v3677_v53 = vpack.c.bf16 %v4128_v5, %v4128_v5  ;;  %v3709_v2 = vpack.c.bf16 %v4125_v48, %v4125_v48  ;;  %v3726_v56 = vpack.c.bf16 %v1155_v10, %v1155_v10  ;;  %v4173_v39 = vld [vmem:[#allocation2 + $0x68] sm:$0xff]  }
 0x56c   : > { %897 = vst.msk [vmem:[#allocation2 + $0x74] sm:$0xf] %vm867_vm1, %v3676_v34  ;;  %v4129_v11 = vpop.trf.xlu1  ;;  %v2922_v34 = vsel %vm563_vm0, %v4171_v42, 0 }
 0x56d   : > { %v4879_v33 = vpop.f32.mrf.mxu1  ;;  %1330 = vst.msk [vmem:[#allocation4 + $0x38] sm:$0xf] %vm867_vm1, %v3725_v46  ;;  %898 = vst.msk [vmem:[#allocation2 + $0x78] sm:$0xf] %vm867_vm1, %v3677_v53  ;;  %v4133_v57 = vunpack.i.h.bf16 %v4129_v11  ;;  %v4233_v46 = vpop.eup %4232 }
 0x56e   : > { %1122 = vst.msk [vmem:[#allocation3 + $0x78] sm:$0xf] %vm867_vm1, %v3709_v2  ;;  %1331 = vst.msk [vmem:[#allocation4 + $0x3c] sm:$0xf] %vm867_vm1, %v3726_v56  ;;  %v1698_v5 = vmul.f32 %v4233_v46, %v4879_v33  ;;  %v4235_v20 = vpop.eup %4234 }
 0x56f   : > { %v3678_v62 = vpack.c.bf16 %v4133_v57, %v4133_v57 }
 0x571   : > { %899 = vst.msk [vmem:[#allocation2 + $0x7c] sm:$0xf] %vm867_vm1, %v3678_v62  ;;  %v4169_v25 = vld [vmem:[#allocation3 + $0x70] sm:$0xff]  }
 0x572   : > { %3917 = vmatmul.mubr.msk.bf16.gmra.mxu1 %vm563_vm0, %v4167_v60  ;;  %v4130_v60 = vunpack.i.l.bf16 %v4129_v11  ;;  %v2928_v38 = vsel %vm563_vm0, %v4169_v25, 0 }
 0x573   : > { %3952 = vmatprep.mubr.msk.bf16.mxu1 %vm563_vm0, %v4172_v37  ;;  %v4174_v40 = vld [vmem:[#allocation2 + $0x70] sm:$0xff]  }
 0x574   : > { %v3710_v3 = vpack.c.bf16 %v4130_v60, %v4130_v60 }
 0x576   : > { %1123 = vst.msk [vmem:[#allocation3 + $0x7c] sm:$0xf] %vm867_vm1, %v3710_v3 }
 0x57d   : > { %v4168_v35 = vld [vmem:[#allocation3 + $0x78] sm:$0xff]  }
 0x57e   : > { %3996 = vmatprep.subr.msk.bf16.mxu1 %vm563_vm0, %v4168_v35  ;;  %v2931_v36 = vsel %vm563_vm0, %v4168_v35, 0 }
 0x57f   : > { %v3874_v44 = vpop.f32.mrf.mxu1  ;;  %3945 = vmatpush3.bf16.xpose.msra.mxu1 %v2931_v36 }
 0x580   : > { %v4888_v58 = vmul.f32 0.17677669, %v3874_v44  ;;  %3997 = vmatprep.subr.msk.bf16.mxu1 %vm563_vm0, %v4169_v25  ;;  %v4175_v44 = vld [vmem:[#allocation2 + $0x78] sm:$0xff]  }
 0x581   : > { %v1964_v51 = vpop.f32.mrf.mxu1 }
 0x582   : > { %v4885_v54 = vmul.f32 0.17677669, %v1964_v51  ;;  %v2009_v24 = vsel %vm1509_vm2, %v4888_v58, -inf }
 0x583   : > { %v3875_v55 = vpop.f32.mrf.mxu1 }
 0x584   : > { %v2003_v59 = vsel %vm1509_vm2, %v4885_v54, -inf  ;;  %v4897_v8 = vmul.f32 0.17677669, %v3875_v55 }
 0x585   : > { %2004 = vmax.xlane.f32.xlu0 %v2003_v59  ;;  %v1967_v61 = vpop.f32.mrf.mxu1 }
 0x586   : > { %v4894_v63 = vmul.f32 0.17677669, %v1967_v61  ;;  %v2012_v15 = vsel %vm1509_vm2, %v4897_v8, -inf }
 0x587   : > { %v3878_v14 = vpop.f32.mrf.mxu1  ;;  %3947 = vmatpush3.bf16.xpose.msra.mxu1 %v2928_v38 }
 0x588   : > { %v2006_v12 = vsel %vm1509_vm2, %v4894_v63, -inf  ;;  %v4904_v9 = vmul.f32 0.17677669, %v3878_v14  ;;  %3998 = vmatprep.subr.msk.bf16.mxu1 %vm563_vm0, %v4170_v41 }
 0x589   : > { %2010 = vmax.xlane.f32.xlu0 %v2009_v24  ;;  %2007 = vmax.xlane.f32.xlu1 %v2006_v12  ;;  %v1980_v17 = vpop.f32.mrf.mxu1 }
 0x58a   : > { %v4908_v13 = vmul.f32 0.17677669, %v1980_v17  ;;  %v2021_v16 = vsel %vm1509_vm2, %v4904_v9, -inf }
 0x58b   : > { %v3879_v18 = vpop.f32.mrf.mxu1 }
 0x58c   : > { %v4912_v7 = vmul.f32 0.17677669, %v3879_v18  ;;  %v2015_v22 = vsel %vm1509_vm2, %v4908_v13, -inf }
 0x58d   : > { %2013 = vmax.xlane.f32.xlu0 %v2012_v15  ;;  %v1983_v23 = vpop.f32.mrf.mxu1 }
 0x58e   : > { %v4916_v26 = vmul.f32 0.17677669, %v1983_v23  ;;  %v2024_v29 = vsel %vm1509_vm2, %v4912_v7, -inf }
 0x58f   : > { %3949 = vmatpush3.bf16.xpose.msra.mxu1 %v2925_v28 }
 0x590   : > { %v2018_v30 = vsel %vm1509_vm2, %v4916_v26, -inf  ;;  %3999 = vmatprep.subr.msk.bf16.mxu1 %vm563_vm0, %v4171_v42 }
 0x591   : > { %2022 = vmax.xlane.f32.xlu0 %v2021_v16 }
 0x595   : > { %2016 = vmax.xlane.f32.xlu0 %v2015_v22 }
 0x597   : > { %3951 = vmatpush3.bf16.xpose.msra.mxu1 %v2922_v34 }
 0x599   : > { %2025 = vmax.xlane.f32.xlu0 %v2024_v29 }
 0x59d   : > { %2019 = vmax.xlane.f32.xlu0 %v2018_v30 }
 0x59e   : > { %3953 = vmatmul.mubr.msk.bf16.vlgmr.msra.gmra.mxu1 %vm563_vm0, %v4173_v39 }
 0x59f   : > { %3956 = vmatprep.mubr.msk.bf16.mxu1 %vm563_vm0, %v4174_v40 }
 0x5a6   : > { %3957 = vmatmul.mubr.msk.bf16.gmra.mxu1 %vm563_vm0, %v4175_v44 }
 0x5ca   : > { %1703 = vxpose.xlu0.b32.start [1/8] (short) (narrow) %v4849_v27, 32  ;;  %v4177_v27 = vld [vmem:[%s5453_s6] sm:$0xff]  }
 0x5cb   : > { %3860 = vmatprep.mubr.msk.bf16.mxu0 %vm563_vm0, %v4177_v27 }
 0x5ce   : > { %1704 = vxpose.xlu0.b32.cont [2/8] (short) (narrow) %v4853_v43, 32 }
 0x5d2   : > { %1705 = vxpose.xlu0.b32.cont [3/8] (short) (narrow) %v4846_v21, 32  ;;  %v1702_v21 = vmul.f32 %v4235_v20, %v4874_v32 }
 0x5d6   : > { %1706 = vxpose.xlu0.b32.cont [4/8] (short) (narrow) %v4851_v31, 32 }
 0x5da   : > { %1707 = vxpose.xlu0.b32.cont [5/8] (short) (narrow) %v4858_v4, 32 }
 0x5de   : > { %1708 = vxpose.xlu0.b32.cont [6/8] (short) (narrow) %v1698_v5, 32 }
 0x5e2   : > { %1709 = vxpose.xlu0.b32.cont [7/8] (short) (narrow) %v4855_v6, 32 }
 0x5e6   : > { %1710 = vxpose.xlu0.b32.end [8/8] (short) (narrow) %v1702_v21, 32 }
 0x60e   : > { %v2005_v19 = vpop.xlane.xlu0 %2004 }
 0x60f   : > { %v2027_v48 = vsub.f32 %v4885_v54, %v2005_v19 }
 0x611   : > { %v2035_v2 = vmul.f32 1.442695, %v2027_v48 }
 0x612   : > { %v2011_v31 = vpop.xlane.xlu0 %2010  ;;  %v2008_v10 = vpop.xlane.xlu1 %2007 }
 0x613   : > { %v2029_v43 = vsub.f32 %v4888_v58, %v2011_v31  ;;  %v2028_v6 = vsub.f32 %v4894_v63, %v2008_v10 }
 0x615   : > { %v2039_v51 = vmul.f32 1.442695, %v2029_v43  ;;  %v2037_v54 = vmul.f32 1.442695, %v2028_v6  ;;  %v4179_v6 = vld [vmem:[#allocation4 + $0x30] sm:$0xff]  }
 0x616   : > { %v2014_v4 = vpop.xlane.xlu0 %2013 }
 0x617   : > { %4236 = vpow2.f32 %v2039_v51  ;;  %v2030_v33 = vsub.f32 %v4897_v8, %v2014_v4 }
 0x618   : > { %4238 = vpow2.f32 %v2035_v2 }
 0x619   : > { %v2041_v32 = vmul.f32 1.442695, %v2030_v33  ;;  %v4178_v33 = vld [vmem:[%s5453_s6 + $0x8] sm:$0xff]  }
 0x61a   : > { %v2023_v53 = vpop.xlane.xlu0 %2022 }
 0x61b   : > { %v2033_v58 = vsub.f32 %v4904_v9, %v2023_v53  ;;  %4240 = vpow2.f32 %v2041_v32  ;;  %v4176_v53 = vld [vmem:[#allocation4 + $0x38] sm:$0xff]  }
 0x61c   : > { %4242 = vpow2.f32 %v2037_v54  ;;  %v4181_v54 = vld [vmem:[#allocation4 + $0x20] sm:$0xff]  }
 0x61d   : > { %v2047_v3 = vmul.f32 1.442695, %v2033_v58 }
 0x61e   : > { %v2017_v55 = vpop.xlane.xlu0 %2016 }
 0x61f   : > { %v2031_v24 = vsub.f32 %v4908_v13, %v2017_v55  ;;  %4244 = vpow2.f32 %v2047_v3 }
 0x621   : > { %v2043_v17 = vmul.f32 1.442695, %v2031_v24  ;;  %v663_v24 = vadd.f32 %v4730_v0, %v4732_v1 }
 0x622   : > { %v2026_v8 = vpop.xlane.xlu0 %2025 }
 0x623   : > { %v2034_v16 = vsub.f32 %v4912_v7, %v2026_v8  ;;  %4246 = vpow2.f32 %v2043_v17 }
 0x624   : > { %v4964_v14 = vpop.eup %4236 }
 0x625   : > { %v2057_v22 = vsel %vm1509_vm2, %v4964_v14, 0.0  ;;  %v4239_v13 = vpop.eup %4238  ;;  %v2049_v29 = vmul.f32 1.442695, %v2034_v16 }
 0x626   : > { %v2020_v23 = vpop.xlane.xlu0 %2019  ;;  %v2051_v35 = vsel %vm1509_vm2, %v4239_v13, 0.0 }
 0x627   : > { %v2032_v30 = vsub.f32 %v4916_v26, %v2020_v23  ;;  %4248 = vpow2.f32 %v2049_v29 }
 0x628   : > { %v4975_v36 = vpop.eup %4240 }
 0x629   : > { %v2045_v7 = vmul.f32 1.442695, %v2032_v30  ;;  %v2060_v25 = vsel %vm1509_vm2, %v4975_v36, 0.0  ;;  %v4243_v38 = vpop.eup %4242 }
 0x62a   : > { %v3914_v11 = vpop.f32.mrf.mxu1  ;;  %v2054_v28 = vsel %vm1509_vm2, %v4243_v38, 0.0 }
 0x62b   : > { %4250 = vpow2.f32 %v2045_v7  ;;  %v4986_v21 = vmul.f32 0.17677669, %v3914_v11  ;;  %v2075_v11 = vpack.c.bf16 %v4243_v38, %v4239_v13 }
 0x62c   : > { %v2474_v56 = vpop.f32.mrf.mxu1  ;;  %v4979_v41 = vpop.eup %4244 }
 0x62d   : > { %v4952_v57 = vmul.f32 0.17677669, %v2474_v56  ;;  %v2069_v26 = vsel %vm1509_vm2, %v4979_v41, 0.0  ;;  %v2519_v51 = vsel %vm1509_vm2, %v4986_v21, -inf  ;;  %v4180_v56 = vld [vmem:[#allocation4 + $0x28] sm:$0xff]  }
 0x62e   : > { %v3915_v59 = vpop.f32.mrf.mxu1 }
 0x62f   : > { %v2513_v60 = vsel %vm1509_vm2, %v4952_v57, -inf  ;;  %v4989_v48 = vmul.f32 0.17677669, %v3915_v59 }
 0x630   : > { %2514 = vmax.xlane.f32.xlu1 %v2513_v60  ;;  %v2477_v61 = vpop.f32.mrf.mxu1  ;;  %v4247_v34 = vpop.eup %4246 }
 0x631   : > { %v4957_v62 = vmul.f32 0.17677669, %v2477_v61  ;;  %v2063_v39 = vsel %vm1509_vm2, %v4247_v34, 0.0  ;;  %v2522_v10 = vsel %vm1509_vm2, %v4989_v48, -inf  ;;  %v2076_v61 = vpack.c.bf16 %v4975_v36, %v4964_v14  ;;  %v672_v14 = vpop.f32.mrf.mxu0 }
 0x632   : > { %v4959_v63 = vpop.f32.mrf.mxu1 }
 0x633   : > { %v2516_v12 = vsel %vm1509_vm2, %v4957_v62, -inf  ;;  %v5005_v55 = vmul.f32 0.17677669, %v4959_v63  ;;  %v659_v63 = vadd.f32 %v4726_v45, %v4728_v47 }
 0x634   : > { %2517 = vmax.xlane.f32.xlu1 %v2516_v12  ;;  %v2490_v9 = vpop.f32.mrf.mxu1  ;;  %v4249_v40 = vpop.eup %4248  ;;  %v669_v12 = vadd.f32 %v4738_v50, %v4736_v49 }
 0x635   : > { %v4966_v15 = vmul.f32 0.17677669, %v2490_v9  ;;  %v2072_v46 = vsel %vm1509_vm2, %v4249_v40, 0.0  ;;  %v2531_v59 = vsel %vm1509_vm2, %v5005_v55, -inf  ;;  %v2078_v8 = vpack.c.bf16 %v4249_v40, %v4979_v41 }
 0x636   : > { %v3919_v20 = vpop.f32.mrf.mxu1  ;;  %v673_v9 = vadd.f32 %v672_v14, %v4741_v52 }
 0x637   : > { %v2525_v18 = vsel %vm1509_vm2, %v4966_v15, -inf  ;;  %v5007_v58 = vmul.f32 0.17677669, %v3919_v20 }
 0x638   : > { %2526 = vmax.xlane.f32.xlu0 %v2525_v18  ;;  %2058 = vadd.xlane.f32.xlu1 %v2057_v22  ;;  %v4251_v27 = vpop.eup %4250  ;;  %v2493_v4 = vpop.f32.mrf.mxu1 }
 0x639   : > { %v2066_v31 = vsel %vm1509_vm2, %v4251_v27, 0.0  ;;  %v4993_v2 = vmul.f32 0.17677669, %v2493_v4  ;;  %v2534_v60 = vsel %vm1509_vm2, %v5007_v58, -inf  ;;  %v2077_v3 = vpack.c.bf16 %v4251_v27, %v4247_v34 }
 0x63b   : > { %v2528_v32 = vsel %vm1509_vm2, %v4993_v2, -inf }
 0x63c   : > { %2052 = vadd.xlane.f32.xlu1 %v2051_v35 }
 0x640   : > { %2061 = vadd.xlane.f32.xlu1 %v2060_v25 }
 0x644   : > { %2055 = vadd.xlane.f32.xlu1 %v2054_v28 }
 0x646   : > { %v1719_v42 = vpop.trf.xlu0 }
 0x648   : > { %2070 = vadd.xlane.f32.xlu1 %v2069_v26 }
 0x64a   : > { %v1720_v37 = vpop.trf.xlu0 }
 0x64b   : > { %v1735_v43 = vpack.c.bf16 %v1720_v37, %v1719_v42 }
 0x64c   : > { %2064 = vadd.xlane.f32.xlu1 %v2063_v39 }
 0x64e   : > { %v1721_v44 = vpop.trf.xlu0 }
 0x650   : > { %2073 = vadd.xlane.f32.xlu1 %v2072_v46 }
 0x652   : > { %v1722_v5 = vpop.trf.xlu0 }
 0x653   : > { %v1736_v19 = vpack.c.bf16 %v1722_v5, %v1721_v44 }
 0x654   : > { %2067 = vadd.xlane.f32.xlu1 %v2066_v31 }
 0x655   : > { %3856 = vmatprep.subr.bf16.mxu0 %v1736_v19 }
 0x656   : > { %3857 = vmatpush3.bf16.msra.mxu0 %v1736_v19 }
 0x657   : > { %3858 = vmatprep.subr.bf16.mxu0 %v1735_v43 }
 0x658   : > { %2520 = vmax.xlane.f32.xlu1 %v2519_v51 }
 0x65a   : > { %3859 = vmatpush3.bf16.msra.mxu0 %v1735_v43 }
 0x65b   : > { %3880 = vmatprep.subr.bf16.mxu0 %v4176_v53 }
 0x65c   : > { %2523 = vmax.xlane.f32.xlu1 %v2522_v10 }
 0x65d   : > { %3861 = vmatmul.mubr.msk.bf16.vlgmr.msra.gmra.mxu0 %vm563_vm0, %v4178_v33 }
 0x65e   : > { %3881 = vmatpush3.bf16.msra.mxu0 %v4176_v53  ;;  %3888 = vmatprep.mubr.msk.bf16.mxu0 %vm1509_vm2, %v2075_v11  ;;  %v5055_v46 = vpop.f32.mrf.mxu1 }
 0x65f   : > { %3882 = vmatprep.subr.bf16.mxu0 %v4179_v6 }
 0x660   : > { %2529 = vmax.xlane.f32.xlu1 %v2528_v32 }
 0x662   : > { %3883 = vmatpush3.bf16.msra.mxu0 %v4179_v6 }
 0x663   : > { %3884 = vmatprep.subr.bf16.mxu0 %v4180_v56 }
 0x664   : > { %2532 = vmax.xlane.f32.xlu1 %v2531_v59 }
 0x666   : > { %3885 = vmatpush3.bf16.msra.mxu0 %v4180_v56 }
 0x667   : > { %3886 = vmatprep.subr.bf16.mxu0 %v4181_v54 }
 0x668   : > { %2535 = vmax.xlane.f32.xlu1 %v2534_v60 }
 0x66a   : > { %3887 = vmatpush3.bf16.msra.mxu0 %v4181_v54 }
 0x66d   : > { %3889 = vmatmul.mubr.msk.bf16.vlgmr.msra.gmra.mxu0 %vm1509_vm2, %v2076_v61 }
 0x66e   : > { %3892 = vmatprep.mubr.msk.bf16.mxu0 %vm1509_vm2, %v2077_v3 }
 0x675   : > { %3893 = vmatmul.mubr.msk.bf16.gmra.mxu0 %vm1509_vm2, %v2078_v8 }
 0x69b   : > { %1156 = vxpose.xlu1.b32.start [1/4] (short) %v659_v63, 128 }
 0x69f   : > { %1157 = vxpose.xlu1.b32.cont [2/4] (short) %v663_v24, 128 }
 0x6a3   : > { %1158 = vxpose.xlu1.b32.cont [3/4] (short) %v669_v12, 128 }
 0x6a7   : > { %1159 = vxpose.xlu1.b32.end [4/4] (short) %v673_v9, 128 }
 0x6b9   : > { %v2515_v17 = vpop.xlane.xlu1 %2514 }
 0x6ba   : > { %v2537_v16 = vsub.f32 %v4952_v57, %v2515_v17 }
 0x6bc   : > { %v2545_v18 = vmul.f32 1.442695, %v2537_v16 }
 0x6bd   : > { %v2518_v22 = vpop.xlane.xlu1 %2517 }
 0x6be   : > { %v2538_v45 = vsub.f32 %v4957_v62, %v2518_v22  ;;  %4252 = vpow2.f32 %v2545_v18 }
 0x6c0   : > { %v2547_v47 = vmul.f32 1.442695, %v2538_v45 }
 0x6c1   : > { %v5028_v13 = vpop.xlane.xlu1 %2058  ;;  %v2527_v36 = vpop.xlane.xlu0 %2526 }
 0x6c2   : > { %4254 = vpow2.f32 %v2547_v47  ;;  %v2541_v25 = vsub.f32 %v4966_v15, %v2527_v36 }
 0x6c4   : > { %v2553_v26 = vmul.f32 1.442695, %v2541_v25 }
 0x6c5   : > { %v5030_v0 = vpop.xlane.xlu1 %2052 }
 0x6c9   : > { %v5032_v1 = vpop.xlane.xlu1 %2061 }
 0x6cb   : > { %v5036_v50 = vpop.eup %4252 }
 0x6cc   : > { %v2561_v33 = vsel %vm1509_vm2, %v5036_v50, 0.0 }
 0x6cd   : > { %v5034_v49 = vpop.xlane.xlu1 %2055 }
 0x6cf   : > { %v5038_v52 = vpop.eup %4254 }
 0x6d0   : > { %v2585_v57 = vpack.c.bf16 %v5038_v52, %v5036_v50 }
 0x6d1   : > { %v5042_v23 = vpop.xlane.xlu1 %2070 }
 0x6d5   : > { %v5044_v62 = vpop.xlane.xlu1 %2064 }
 0x6d9   : > { %v5046_v29 = vpop.xlane.xlu1 %2073 }
 0x6dd   : > { %v5048_v30 = vpop.xlane.xlu1 %2067 }
 0x6e1   : > { %v2521_v35 = vpop.xlane.xlu1 %2520 }
 0x6e2   : > { %v2539_v7 = vsub.f32 %v4986_v21, %v2521_v35  ;;  %v5058_v21 = vpop.f32.mrf.mxu1 }
 0x6e4   : > { %v2549_v38 = vmul.f32 1.442695, %v2539_v7  ;;  %v3955_v43 = vpop.f32.mrf.mxu1 }
 0x6e5   : > { %v2524_v41 = vpop.xlane.xlu1 %2523  ;;  %v5092_v61 = vmul.f32 0.17677669, %v3955_v43 }
 0x6e6   : > { %v2540_v28 = vsub.f32 %v4989_v48, %v2524_v41  ;;  %4256 = vpow2.f32 %v2549_v38  ;;  %v2970_v53 = vpop.f32.mrf.mxu1 }
 0x6e7   : > { %v5088_v59 = vmul.f32 0.17677669, %v2970_v53  ;;  %v3015_v24 = vsel %vm1509_vm2, %v5092_v61, -inf }
 0x6e8   : > { %v2551_v42 = vmul.f32 1.442695, %v2540_v28  ;;  %v5074_v10 = vpop.f32.mrf.mxu1 }
 0x6e9   : > { %v2530_v34 = vpop.xlane.xlu1 %2529  ;;  %v3009_v3 = vsel %vm1509_vm2, %v5088_v59, -inf }
 0x6ea   : > { %4258 = vpow2.f32 %v2551_v42  ;;  %v2542_v37 = vsub.f32 %v4993_v2, %v2530_v34 }
 0x6eb   : > { %4260 = vpow2.f32 %v2553_v26 }
 0x6ec   : > { %v2555_v39 = vmul.f32 1.442695, %v2542_v37 }
 0x6ed   : > { %v2533_v40 = vpop.xlane.xlu1 %2532 }
 0x6ee   : > { %4262 = vpow2.f32 %v2555_v39  ;;  %v2543_v44 = vsub.f32 %v5005_v55, %v2533_v40  ;;  %v5082_v55 = vpop.f32.mrf.mxu1 }
 0x6f0   : > { %v2557_v15 = vmul.f32 1.442695, %v2543_v44  ;;  %v3959_v54 = vpop.f32.mrf.mxu1 }
 0x6f1   : > { %v2536_v27 = vpop.xlane.xlu1 %2535  ;;  %v5100_v12 = vmul.f32 0.17677669, %v3959_v54 }
 0x6f2   : > { %v2544_v5 = vsub.f32 %v5007_v58, %v2536_v27  ;;  %4264 = vpow2.f32 %v2557_v15  ;;  %v2986_v8 = vpop.f32.mrf.mxu1 }
 0x6f3   : > { %v5060_v19 = vpop.eup %4256  ;;  %v5096_v63 = vmul.f32 0.17677669, %v2986_v8  ;;  %v3027_v9 = vsel %vm1509_vm2, %v5100_v12, -inf }
 0x6f4   : > { %v2559_v20 = vmul.f32 1.442695, %v2544_v5 }
 0x6f5   : > { %v3021_v14 = vsel %vm1509_vm2, %v5096_v63, -inf }
 0x6f6   : > { %4266 = vpow2.f32 %v2559_v20 }
 0x6f7   : > { %v5062_v31 = vpop.eup %4258  ;;  %4268 = vrcp.f32 %v5030_v0 }
 0x6f8   : > { %v2586_v4 = vpack.c.bf16 %v5062_v31, %v5060_v19  ;;  %v5066_v48 = vpop.eup %4260  ;;  %v2570_v11 = vsel %vm1509_vm2, %v5062_v31, 0.0  ;;  %4270 = vrcp.f32 %v5034_v49 }
 0x6f9   : > { %4272 = vrcp.f32 %v5028_v13 }
 0x6fa   : > { %4274 = vrcp.f32 %v5032_v1 }
 0x6fb   : > { %v5068_v51 = vpop.eup %4262  ;;  %4276 = vrcp.f32 %v5044_v62 }
 0x6fc   : > { %v2587_v2 = vpack.c.bf16 %v5068_v51, %v5066_v48  ;;  %v2576_v58 = vsel %vm1509_vm2, %v5068_v51, 0.0  ;;  %4278 = vrcp.f32 %v5048_v30 }
 0x6fd   : > { %4280 = vrcp.f32 %v5042_v23  ;;  %v4182_v23 = vld [vmem:[%s5453_s6] sm:$0xff]  }
 0x6fe   : > { %2562 = vadd.xlane.f32.xlu1 %v2561_v33  ;;  %4282 = vrcp.f32 %v5046_v29  ;;  %3900 = vmatprep.mubr.msk.bf16.mxu0 %vm563_vm0, %v4182_v23 }
 0x6ff   : > { %v5078_v6 = vpop.eup %4264 }
 0x702   : > { %2571 = vadd.xlane.f32.xlu1 %v2570_v11 }
 0x703   : > { %v5080_v32 = vpop.eup %4266 }
 0x704   : > { %v2588_v56 = vpack.c.bf16 %v5080_v32, %v5078_v6  ;;  %v2582_v60 = vsel %vm1509_vm2, %v5080_v32, 0.0  ;;  %v4269_v49 = vpop.eup %4268 }
 0x705   : > { %v4271_v13 = vpop.eup %4270 }
 0x706   : > { %2577 = vadd.xlane.f32.xlu1 %v2576_v58  ;;  %v4273_v1 = vpop.eup %4272 }
 0x707   : > { %v4275_v62 = vpop.eup %4274 }
 0x708   : > { %v4277_v30 = vpop.eup %4276 }
 0x70a   : > { %2583 = vadd.xlane.f32.xlu1 %v2582_v60 }
 0x70e   : > { %3010 = vmax.xlane.f32.xlu1 %v3009_v3 }
 0x712   : > { %3016 = vmax.xlane.f32.xlu1 %v3015_v24 }
 0x716   : > { %3022 = vmax.xlane.f32.xlu1 %v3021_v14 }
 0x717   : > { %v1172_v17 = vpop.trf.xlu1 }
 0x718   : > { %v3727_v16 = vpack.c.bf16 %v1172_v17, %v1172_v17 }
 0x71a   : > { %3028 = vmax.xlane.f32.xlu1 %v3027_v9  ;;  %1332 = vst.msk [vmem:[#allocation4 + $0x40] sm:$0xf] %vm867_vm1, %v3727_v16 }
 0x71b   : > { %v1173_v18 = vpop.trf.xlu1 }
 0x71c   : > { %v3728_v22 = vpack.c.bf16 %v1173_v18, %v1173_v18  ;;  %v4279_v18 = vpop.eup %4278 }
 0x71d   : > { %v5108_v45 = vpop.f32.mrf.mxu0  ;;  %v4281_v29 = vpop.eup %4280 }
 0x71e   : > { %1333 = vst.msk [vmem:[#allocation4 + $0x44] sm:$0xf] %vm867_vm1, %v3728_v22 }
 0x71f   : > { %v1174_v47 = vpop.trf.xlu1  ;;  %v5112_v36 = vpop.f32.mrf.mxu0 }
 0x720   : > { %v3729_v35 = vpack.c.bf16 %v1174_v47, %v1174_v47 }
 0x721   : > { %v5116_v38 = vpop.f32.mrf.mxu0 }
 0x722   : > { %1334 = vst.msk [vmem:[#allocation4 + $0x48] sm:$0xf] %vm867_vm1, %v3729_v35 }
 0x723   : > { %v1175_v7 = vpop.trf.xlu1  ;;  %v5120_v42 = vpop.f32.mrf.mxu0 }
 0x724   : > { %v3730_v25 = vpack.c.bf16 %v1175_v7, %v1175_v7 }
 0x726   : > { %1335 = vst.msk [vmem:[#allocation4 + $0x4c] sm:$0xf] %vm867_vm1, %v3730_v25 }
 0x727   : > { %v1176_v41 = vpop.trf.xlu1 }
 0x728   : > { %v3731_v28 = vpack.c.bf16 %v1176_v41, %v1176_v41 }
 0x72a   : > { %1336 = vst.msk [vmem:[#allocation4 + $0x50] sm:$0xf] %vm867_vm1, %v3731_v28  ;;  %v4283_v28 = vpop.eup %4282 }
 0x72b   : > { %v1177_v0 = vpop.trf.xlu1 }
 0x72c   : > { %v3732_v26 = vpack.c.bf16 %v1177_v0, %v1177_v0 }
 0x72d   : > { %v3890_v34 = vpop.f32.mrf.mxu0 }
 0x72e   : > { %1337 = vst.msk [vmem:[#allocation4 + $0x54] sm:$0xf] %vm867_vm1, %v3732_v26  ;;  %v2185_v11 = vmul.f32 %v4273_v1, %v3890_v34 }
 0x72f   : > { %v2149_v37 = vpop.f32.mrf.mxu0  ;;  %v1178_v39 = vpop.trf.xlu1 }
 0x730   : > { %v2181_v40 = vmul.f32 %v4269_v49, %v2149_v37  ;;  %v3733_v44 = vpack.c.bf16 %v1178_v39, %v1178_v39 }
 0x731   : > { %v3891_v15 = vpop.f32.mrf.mxu0 }
 0x732   : > { %2196 = vxpose.xlu0.b32.start [1/8] (short) (narrow) %v2181_v40, 32  ;;  %1338 = vst.msk [vmem:[#allocation4 + $0x58] sm:$0xf] %vm867_vm1, %v3733_v44  ;;  %v2187_v3 = vmul.f32 %v4275_v62, %v3891_v15  ;;  %v2564_v44 = vsel %vm1509_vm2, %v5038_v52, 0.0  ;;  %v2567_v15 = vsel %vm1509_vm2, %v5060_v19, 0.0 }
 0x733   : > { %v2152_v27 = vpop.f32.mrf.mxu0  ;;  %v1179_v5 = vpop.trf.xlu1 }
 0x734   : > { %v2183_v20 = vmul.f32 %v4271_v13, %v2152_v27  ;;  %v3734_v43 = vpack.c.bf16 %v1179_v5, %v1179_v5  ;;  %v2573_v13 = vsel %vm1509_vm2, %v5066_v48, 0.0  ;;  %v2998_v27 = vmul.f32 0.17677669, %v5058_v21 }
 0x735   : > { %v3894_v53 = vpop.f32.mrf.mxu0  ;;  %v2579_v5 = vsel %vm1509_vm2, %v5078_v6, 0.0 }
 0x736   : > { %2197 = vxpose.xlu0.b32.cont [2/8] (short) (narrow) %v2183_v20, 32  ;;  %1339 = vst.msk [vmem:[#allocation4 + $0x5c] sm:$0xf] %vm867_vm1, %v3734_v43  ;;  %v2193_v25 = vmul.f32 %v4281_v29, %v3894_v53  ;;  %v3000_v20 = vmul.f32 0.17677669, %v5055_v46  ;;  %v3006_v43 = vsel %vm1509_vm2, %v2998_v27, -inf }
 0x737   : > { %v1180_v33 = vpop.trf.xlu1  ;;  %v2165_v54 = vpop.f32.mrf.mxu0  ;;  %v5154_v53 = vmul.f32 0.17677669, %v5082_v55 }
 0x738   : > { %v3735_v58 = vpack.c.bf16 %v1180_v33, %v1180_v33  ;;  %v2189_v9 = vmul.f32 %v4277_v30, %v2165_v54  ;;  %v3012_v1 = vsel %vm1509_vm2, %v3000_v20, -inf  ;;  %v5158_v33 = vmul.f32 0.17677669, %v5074_v10  ;;  %v4183_v10 = vld [vmem:[%s5453_s6 + $0x8] sm:$0xff]   ;;  %v4187_v30 = vld [vmem:[#allocation4 + $0x40] sm:$0xff]  }
 0x739   : > { %v3895_v24 = vpop.f32.mrf.mxu0  ;;  %v3018_v21 = vsel %vm1509_vm2, %v5154_v53, -inf }
 0x73a   : > { %2198 = vxpose.xlu0.b32.cont [3/8] (short) (narrow) %v2185_v11, 32  ;;  %1340 = vst.msk [vmem:[#allocation4 + $0x60] sm:$0xf] %vm867_vm1, %v3735_v58  ;;  %v2195_v26 = vmul.f32 %v4283_v28, %v3895_v24  ;;  %v3024_v11 = vsel %vm1509_vm2, %v5158_v33, -inf  ;;  %v4186_v24 = vld [vmem:[#allocation4 + $0x48] sm:$0xff]  }
 0x73b   : > { %v1181_v60 = vpop.trf.xlu1  ;;  %v2168_v16 = vpop.f32.mrf.mxu0 }
 0x73c   : > { %v3736_v8 = vpack.c.bf16 %v1181_v60, %v1181_v60  ;;  %v2191_v47 = vmul.f32 %v4279_v18, %v2168_v16 }
 0x73e   : > { %2199 = vxpose.xlu0.b32.cont [4/8] (short) (narrow) %v2187_v3, 32  ;;  %1341 = vst.msk [vmem:[#allocation4 + $0x64] sm:$0xf] %vm867_vm1, %v3736_v8  ;;  %v4184_v3 = vld [vmem:[#allocation4 + $0x58] sm:$0xff]   ;;  %v4185_v8 = vld [vmem:[#allocation4 + $0x50] sm:$0xff]  }
 0x73f   : > { %v1182_v14 = vpop.trf.xlu1 }
 0x740   : > { %v3737_v17 = vpack.c.bf16 %v1182_v14, %v1182_v14 }
 0x742   : > { %2200 = vxpose.xlu0.b32.cont [5/8] (short) (narrow) %v2189_v9, 32  ;;  %1342 = vst.msk [vmem:[#allocation4 + $0x68] sm:$0xf] %vm867_vm1, %v3737_v17 }
 0x743   : > { %v1183_v22 = vpop.trf.xlu1 }
 0x744   : > { %v3738_v35 = vpack.c.bf16 %v1183_v22, %v1183_v22 }
 0x746   : > { %2201 = vxpose.xlu0.b32.cont [6/8] (short) (narrow) %v2191_v47, 32  ;;  %1343 = vst.msk [vmem:[#allocation4 + $0x6c] sm:$0xf] %vm867_vm1, %v3738_v35 }
 0x747   : > { %v1184_v7 = vpop.trf.xlu1 }
 0x748   : > { %v3739_v41 = vpack.c.bf16 %v1184_v7, %v1184_v7 }
 0x74a   : > { %2202 = vxpose.xlu0.b32.cont [7/8] (short) (narrow) %v2193_v25, 32  ;;  %1344 = vst.msk [vmem:[#allocation4 + $0x70] sm:$0xf] %vm867_vm1, %v3739_v41 }
 0x74b   : > { %v1185_v0 = vpop.trf.xlu1 }
 0x74c   : > { %v3740_v34 = vpack.c.bf16 %v1185_v0, %v1185_v0 }
 0x74e   : > { %2203 = vxpose.xlu0.b32.end [8/8] (short) (narrow) %v2195_v26, 32  ;;  %1345 = vst.msk [vmem:[#allocation4 + $0x74] sm:$0xf] %vm867_vm1, %v3740_v34 }
 0x74f   : > { %v1186_v49 = vpop.trf.xlu1 }
 0x750   : > { %v3741_v37 = vpack.c.bf16 %v1186_v49, %v1186_v49 }
 0x752   : > { %1346 = vst.msk [vmem:[#allocation4 + $0x78] sm:$0xf] %vm867_vm1, %v3741_v37 }
 0x753   : > { %v1187_v39 = vpop.trf.xlu1 }
 0x754   : > { %v3742_v40 = vpack.c.bf16 %v1187_v39, %v1187_v39 }
 0x756   : > { %1347 = vst.msk [vmem:[#allocation4 + $0x7c] sm:$0xf] %vm867_vm1, %v3742_v40 }
 0x77b   : > { %2565 = vadd.xlane.f32.xlu0 %v2564_v44 }
 0x77f   : > { %2568 = vadd.xlane.f32.xlu0 %v2567_v15 }
 0x783   : > { %2574 = vadd.xlane.f32.xlu0 %v2573_v13 }
 0x787   : > { %2580 = vadd.xlane.f32.xlu0 %v2579_v5  ;;  %v5184_v50 = vpop.xlane.xlu1 %2562 }
 0x78b   : > { %3007 = vmax.xlane.f32.xlu0 %v3006_v43  ;;  %v5186_v52 = vpop.xlane.xlu1 %2571 }
 0x78f   : > { %3013 = vmax.xlane.f32.xlu0 %v3012_v1 }
 0x793   : > { %3019 = vmax.xlane.f32.xlu0 %v3018_v21 }
 0x797   : > { %3025 = vmax.xlane.f32.xlu0 %v3024_v11 }
 0x7ae   : > { %v2212_v46 = vpop.trf.xlu0 }
 0x7b2   : > { %v2213_v58 = vpop.trf.xlu0 }
 0x7b3   : > { %v2228_v60 = vpack.c.bf16 %v2213_v58, %v2212_v46 }
 0x7b6   : > { %v2214_v54 = vpop.trf.xlu0 }
 0x7ba   : > { %v2215_v62 = vpop.trf.xlu0 }
 0x7bb   : > { %v2229_v55 = vpack.c.bf16 %v2215_v62, %v2214_v54 }
 0x7bd   : > { %3896 = vmatprep.subr.bf16.mxu0 %v2229_v55 }
 0x7be   : > { %3897 = vmatpush3.bf16.msra.mxu0 %v2229_v55 }
 0x7bf   : > { %3898 = vmatprep.subr.bf16.mxu0 %v2228_v60 }
 0x7c2   : > { %3899 = vmatpush3.bf16.msra.mxu0 %v2228_v60 }
 0x7c3   : > { %3920 = vmatprep.subr.bf16.mxu0 %v4184_v3 }
 0x7c5   : > { %3901 = vmatmul.mubr.msk.bf16.vlgmr.msra.gmra.mxu0 %vm563_vm0, %v4183_v10 }
 0x7c6   : > { %3921 = vmatpush3.bf16.msra.mxu0 %v4184_v3  ;;  %3928 = vmatprep.mubr.msk.bf16.mxu0 %vm1509_vm2, %v2585_v57  ;;  %v5188_v57 = vpop.xlane.xlu1 %2577 }
 0x7c7   : > { %3922 = vmatprep.subr.bf16.mxu0 %v4185_v8 }
 0x7ca   : > { %3923 = vmatpush3.bf16.msra.mxu0 %v4185_v8  ;;  %v5194_v31 = vpop.xlane.xlu1 %2583 }
 0x7cb   : > { %3924 = vmatprep.subr.bf16.mxu0 %v4186_v24 }
 0x7ce   : > { %3925 = vmatpush3.bf16.msra.mxu0 %v4186_v24  ;;  %v3011_v48 = vpop.xlane.xlu1 %3010 }
 0x7cf   : > { %3926 = vmatprep.subr.bf16.mxu0 %v4187_v30 }
 0x7d2   : > { %3927 = vmatpush3.bf16.msra.mxu0 %v4187_v30  ;;  %v3017_v17 = vpop.xlane.xlu1 %3016 }
 0x7d3   : > { %v3033_v18 = vsub.f32 %v5092_v61, %v3017_v17 }
 0x7d5   : > { %3929 = vmatmul.mubr.msk.bf16.vlgmr.msra.gmra.mxu0 %vm1509_vm2, %v2586_v4  ;;  %v3044_v35 = vmul.f32 1.442695, %v3033_v18 }
 0x7d6   : > { %3932 = vmatprep.mubr.msk.bf16.mxu0 %vm1509_vm2, %v2587_v2  ;;  %v3031_v2 = vsub.f32 %v5088_v59, %v3011_v48  ;;  %v3023_v7 = vpop.xlane.xlu1 %3022 }
 0x7d7   : > { %v3035_v59 = vsub.f32 %v5096_v63, %v3023_v7 }
 0x7d9   : > { %v3048_v0 = vmul.f32 1.442695, %v3035_v59 }
 0x7da   : > { %v3029_v49 = vpop.xlane.xlu1 %3028 }
 0x7db   : > { %v3037_v37 = vsub.f32 %v5100_v12, %v3029_v49 }
 0x7dd   : > { %3933 = vmatmul.mubr.msk.bf16.gmra.mxu0 %vm1509_vm2, %v2588_v56  ;;  %v3040_v56 = vmul.f32 1.442695, %v3031_v2  ;;  %v3052_v44 = vmul.f32 1.442695, %v3037_v37  ;;  %v4191_v37 = vld [vmem:[#allocation4 + $0x70] sm:$0xff]  }
 0x804   : > { %v5190_v14 = vpop.xlane.xlu0 %2565 }
 0x808   : > { %v5192_v19 = vpop.xlane.xlu0 %2568 }
 0x80c   : > { %v5196_v4 = vpop.xlane.xlu0 %2574 }
 0x810   : > { %v5198_v51 = vpop.xlane.xlu0 %2580 }
 0x814   : > { %v3008_v6 = vpop.xlane.xlu0 %3007 }
 0x815   : > { %v3030_v32 = vsub.f32 %v2998_v27, %v3008_v6 }
 0x817   : > { %v3038_v9 = vmul.f32 1.442695, %v3030_v32 }
 0x818   : > { %v3014_v16 = vpop.xlane.xlu0 %3013 }
 0x819   : > { %4284 = vpow2.f32 %v3038_v9  ;;  %v3032_v23 = vsub.f32 %v3000_v20, %v3014_v16 }
 0x81a   : > { %4286 = vpow2.f32 %v3040_v56 }
 0x81b   : > { %v3042_v22 = vmul.f32 1.442695, %v3032_v23 }
 0x81c   : > { %v3020_v47 = vpop.xlane.xlu0 %3019 }
 0x81d   : > { %4288 = vpow2.f32 %v3042_v22  ;;  %v3034_v29 = vsub.f32 %v5154_v53, %v3020_v47  ;;  %v2236_v22 = vld [vmem:[%s5454_s7 + $0x10] sm:$0xff]  ;;  %v5267_v47 = vld [vmem:[%s5454_s7 + $0x18] sm:$0xff] }
 0x81e   : > { %4290 = vpow2.f32 %v3044_v35  ;;  %v5273_v35 = vld [vmem:[%s5454_s7 + $0x8] sm:$0xff] }
 0x81f   : > { %v3046_v25 = vmul.f32 1.442695, %v3034_v29 }
 0x820   : > { %v3026_v41 = vpop.xlane.xlu0 %3025 }
 0x821   : > { %4292 = vpow2.f32 %v3046_v25  ;;  %v3036_v26 = vsub.f32 %v5158_v33, %v3026_v41 }
 0x822   : > { %4294 = vpow2.f32 %v3048_v0 }
 0x823   : > { %v3050_v39 = vmul.f32 1.442695, %v3036_v26  ;;  %v4188_v26 = vld [vmem:[#allocation4 + $0x78] sm:$0xff]  }
 0x825   : > { %4296 = vpow2.f32 %v3050_v39  ;;  %v4192_v39 = vld [vmem:[#allocation4 + $0x68] sm:$0xff]  }
 0x826   : > { %v5204_v28 = vpop.eup %4284  ;;  %4298 = vpow2.f32 %v3052_v44 }
 0x827   : > { %v3054_v61 = vsel %vm1509_vm2, %v5204_v28, 0.0  ;;  %v5209_v34 = vpop.eup %4286  ;;  %4300 = vrcp.f32 %v5184_v50 }
 0x828   : > { %3055 = vadd.xlane.f32.xlu1 %v3054_v61  ;;  %v3057_v63 = vsel %vm1509_vm2, %v5209_v34, 0.0  ;;  %4302 = vrcp.f32 %v5190_v14  ;;  %v4190_v61 = vld [vmem:[%s5453_s6 + $0x8] sm:$0xff]   ;;  %v3078_v49 = vpack.c.bf16 %v5209_v34, %v5204_v28 }
 0x829   : > { %4304 = vrcp.f32 %v5192_v19 }
 0x82a   : > { %v5214_v40 = vpop.eup %4288  ;;  %4306 = vrcp.f32 %v5186_v52 }
 0x82b   : > { %v3060_v15 = vsel %vm1509_vm2, %v5214_v40, 0.0  ;;  %v5218_v13 = vpop.eup %4290  ;;  %4308 = vrcp.f32 %v5196_v4 }
 0x82c   : > { %3058 = vadd.xlane.f32.xlu1 %v3057_v63  ;;  %v3063_v27 = vsel %vm1509_vm2, %v5218_v13, 0.0  ;;  %4310 = vrcp.f32 %v5188_v57  ;;  %v4189_v57 = vld [vmem:[%s5453_s6] sm:$0xff]   ;;  %v3079_v44 = vpack.c.bf16 %v5218_v13, %v5214_v40 }
 0x82d   : > { %4312 = vrcp.f32 %v5198_v51  ;;  %3940 = vmatprep.mubr.msk.bf16.mxu0 %vm563_vm0, %v4189_v57  ;;  %v4193_v63 = vld [vmem:[#allocation4 + $0x60] sm:$0xff]  }
 0x82e   : > { %v5222_v12 = vpop.eup %4292  ;;  %4314 = vrcp.f32 %v5194_v31  ;;  %v2234_v31 = vld [vmem:[%s5454_s7] sm:$0xff] }
 0x82f   : > { %v3066_v5 = vsel %vm1509_vm2, %v5222_v12, 0.0  ;;  %v5226_v20 = vpop.eup %4294 }
 0x830   : > { %3061 = vadd.xlane.f32.xlu1 %v3060_v15  ;;  %v3069_v43 = vsel %vm1509_vm2, %v5226_v20, 0.0  ;;  %v3080_v28 = vpack.c.bf16 %v5226_v20, %v5222_v12 }
 0x832   : > { %v5230_v53 = vpop.eup %4296 }
 0x833   : > { %v3072_v1 = vsel %vm1509_vm2, %v5230_v53, 0.0  ;;  %v5234_v33 = vpop.eup %4298 }
 0x834   : > { %3064 = vadd.xlane.f32.xlu1 %v3063_v27  ;;  %v3075_v21 = vsel %vm1509_vm2, %v5234_v33, 0.0  ;;  %v4301_v55 = vpop.eup %4300  ;;  %v3081_v34 = vpack.c.bf16 %v5234_v33, %v5230_v53 }
 0x835   : > { %v4303_v8 = vpop.eup %4302 }
 0x836   : > { %v4305_v14 = vpop.eup %4304 }
 0x837   : > { %v4307_v52 = vpop.eup %4306 }
 0x838   : > { %3067 = vadd.xlane.f32.xlu1 %v3066_v5  ;;  %v4309_v4 = vpop.eup %4308 }
 0x839   : > { %v4311_v9 = vpop.eup %4310 }
 0x83a   : > { %v4313_v51 = vpop.eup %4312 }
 0x83b   : > { %v4315_v23 = vpop.eup %4314 }
 0x83c   : > { %3070 = vadd.xlane.f32.xlu1 %v3069_v43 }
 0x840   : > { %3073 = vadd.xlane.f32.xlu1 %v3072_v1  ;;  %v1830_v1 = vld [vmem:[%s4497_s20] sm:$0xff] }
 0x844   : > { %3076 = vadd.xlane.f32.xlu1 %v3075_v21 }
 0x885   : > { %v5238_v11 = vpop.f32.mrf.mxu0 }
 0x887   : > { %v5241_v46 = vpop.f32.mrf.mxu0 }
 0x889   : > { %v5244_v58 = vpop.f32.mrf.mxu0 }
 0x88b   : > { %v5247_v54 = vpop.f32.mrf.mxu0 }
 0x895   : > { %v3930_v62 = vpop.f32.mrf.mxu0 }
 0x896   : > { %v2695_v19 = vmul.f32 %v4305_v14, %v3930_v62 }
 0x897   : > { %v2659_v60 = vpop.f32.mrf.mxu0 }
 0x898   : > { %v2691_v10 = vmul.f32 %v4301_v55, %v2659_v60 }
 0x899   : > { %v3931_v3 = vpop.f32.mrf.mxu0 }
 0x89a   : > { %2706 = vxpose.xlu0.b32.start [1/8] (short) (narrow) %v2691_v10, 32  ;;  %v2697_v2 = vmul.f32 %v4307_v52, %v3931_v3 }
 0x89b   : > { %v2662_v24 = vpop.f32.mrf.mxu0 }
 0x89c   : > { %v2693_v30 = vmul.f32 %v4303_v8, %v2662_v24 }
 0x89d   : > { %v3934_v50 = vpop.f32.mrf.mxu0 }
 0x89e   : > { %2707 = vxpose.xlu0.b32.cont [2/8] (short) (narrow) %v2693_v30, 32  ;;  %v2703_v16 = vmul.f32 %v4313_v51, %v3934_v50 }
 0x89f   : > { %v2675_v48 = vpop.f32.mrf.mxu0 }
 0x8a0   : > { %v2699_v32 = vmul.f32 %v4309_v4, %v2675_v48  ;;  %v5325_v48 = vld [vmem:[%s4497_s20 + $0x28] sm:$0xff] }
 0x8a1   : > { %v3935_v6 = vpop.f32.mrf.mxu0 }
 0x8a2   : > { %2708 = vxpose.xlu0.b32.cont [3/8] (short) (narrow) %v2695_v19, 32  ;;  %v2705_v18 = vmul.f32 %v4315_v23, %v3935_v6  ;;  %v5328_v6 = vld [vmem:[%s4497_s20 + $0x8] sm:$0xff] }
 0x8a3   : > { %v2678_v56 = vpop.f32.mrf.mxu0 }
 0x8a4   : > { %v2701_v17 = vmul.f32 %v4311_v9, %v2678_v56 }
 0x8a6   : > { %2709 = vxpose.xlu0.b32.cont [4/8] (short) (narrow) %v2697_v2, 32 }
 0x8aa   : > { %2710 = vxpose.xlu0.b32.cont [5/8] (short) (narrow) %v2699_v32, 32 }
 0x8ae   : > { %2711 = vxpose.xlu0.b32.cont [6/8] (short) (narrow) %v2701_v17, 32 }
 0x8b1   : > { %v3056_v50 = vpop.xlane.xlu1 %3055 }
 0x8b2   : > { %2712 = vxpose.xlu0.b32.cont [7/8] (short) (narrow) %v2703_v16, 32  ;;  %4316 = vrcp.f32 %v3056_v50 }
 0x8b6   : > { %2713 = vxpose.xlu0.b32.end [8/8] (short) (narrow) %v2705_v18, 32 }
 0x8bf   : > { %v4317_v23 = vpop.eup %4316 }
 0x8df   : > { %2240 = vperm.xlu0 %4044, %v2234_v31  }
 0x8e3   : > { %2250 = vperm.xlu0 %4044, %v2236_v22  }
 0x8e7   : > { %2255 = vperm.xlu0 %4044, %v5267_v47  }
 0x8eb   : > { %3243 = vperm.xlu0 %4044, %v2234_v31  }
 0x8ef   : > { %3248 = vperm.xlu0 %4044, %v5273_v35  }
 0x8f3   : > { %3253 = vperm.xlu0 %4044, %v2236_v22  }
 0x8f7   : > { %3258 = vperm.xlu0 %4044, %v5267_v47  }
 0x8fb   : > { %1747 = vperm.xlu0 %4044, %v2234_v31  }
 0x8ff   : > { %1757 = vperm.xlu0 %4044, %v2236_v22  }
 0x903   : > { %2750 = vperm.xlu0 %4044, %v2234_v31  }
 0x907   : > { %2760 = vperm.xlu0 %4044, %v2236_v22  }
 0x916   : > { %v2722_v29 = vpop.trf.xlu0 }
 0x91a   : > { %v2723_v7 = vpop.trf.xlu0 }
 0x91b   : > { %v2738_v0 = vpack.c.bf16 %v2723_v7, %v2722_v29 }
 0x91e   : > { %v2724_v59 = vpop.trf.xlu0 }
 0x922   : > { %v2725_v25 = vpop.trf.xlu0 }
 0x923   : > { %v2739_v41 = vpack.c.bf16 %v2725_v25, %v2724_v59 }
 0x925   : > { %3936 = vmatprep.subr.bf16.mxu0 %v2739_v41 }
 0x926   : > { %3937 = vmatpush3.bf16.msra.mxu0 %v2739_v41 }
 0x927   : > { %3938 = vmatprep.subr.bf16.mxu0 %v2738_v0 }
 0x92a   : > { %3939 = vmatpush3.bf16.msra.mxu0 %v2738_v0 }
 0x92b   : > { %3960 = vmatprep.subr.bf16.mxu0 %v4188_v26 }
 0x92d   : > { %3941 = vmatmul.mubr.msk.bf16.vlgmr.msra.gmra.mxu0 %vm563_vm0, %v4190_v61 }
 0x92e   : > { %3961 = vmatpush3.bf16.msra.mxu0 %v4188_v26  ;;  %3968 = vmatprep.mubr.msk.bf16.mxu0 %vm1509_vm2, %v3078_v49 }
 0x92f   : > { %3962 = vmatprep.subr.bf16.mxu0 %v4191_v37 }
 0x932   : > { %3963 = vmatpush3.bf16.msra.mxu0 %v4191_v37 }
 0x933   : > { %3964 = vmatprep.subr.bf16.mxu0 %v4192_v39 }
 0x936   : > { %3965 = vmatpush3.bf16.msra.mxu0 %v4192_v39 }
 0x937   : > { %3966 = vmatprep.subr.bf16.mxu0 %v4193_v63 }
 0x93a   : > { %3967 = vmatpush3.bf16.msra.mxu0 %v4193_v63 }
 0x93d   : > { %3969 = vmatmul.mubr.msk.bf16.vlgmr.msra.gmra.mxu0 %vm1509_vm2, %v3079_v44 }
 0x93e   : > { %3972 = vmatprep.mubr.msk.bf16.mxu0 %vm1509_vm2, %v3080_v28 }
 0x945   : > { %3973 = vmatmul.mubr.msk.bf16.gmra.mxu0 %vm1509_vm2, %v3081_v34 }
 0x95a   : > { %v2241_v15 = vpop.permute.xlu0 %2240 }
 0x95b   : > { %v2309_v27 = vadd.f32 %v5241_v46, %v2241_v15  ;;  %v1832_v46 = vld [vmem:[%s4497_s20 + $0x20] sm:$0xff] }
 0x95d   : > { %2331 = vrot.lane.b32.xlu0 %v2309_v27, %s4395_s11  ;;  %v4194_v27 = vld [vmem:[%s5453_s6] sm:$0xff]  }
 0x95e   : > { %v2251_v40 = vpop.permute.xlu0 %2250  ;;  %3980 = vmatprep.mubr.msk.bf16.mxu0 %vm563_vm0, %v4194_v27 }
 0x95f   : > { %v2317_v13 = vadd.f32 %v5238_v11, %v2251_v40 }
 0x961   : > { %2335 = vrot.lane.b32.xlu0 %v2317_v13, %s4395_s11 }
 0x962   : > { %v5297_v12 = vpop.permute.xlu0 %2255 }
 0x966   : > { %v5299_v5 = vpop.permute.xlu0 %3243 }
 0x96a   : > { %v5301_v20 = vpop.permute.xlu0 %3248 }
 0x96e   : > { %v5303_v43 = vpop.permute.xlu0 %3253 }
 0x972   : > { %v5305_v53 = vpop.permute.xlu0 %3258 }
 0x976   : > { %v1748_v33 = vpop.permute.xlu0 %1747 }
 0x977   : > { %v1816_v21 = vadd.f32 %v5112_v36, %v1748_v33 }
 0x979   : > { %v1834_v11 = vadd.f32 %v1830_v1, %v1816_v21 }
 0x97a   : > { %v1758_v62 = vpop.permute.xlu0 %1757 }
 0x97b   : > { %1838 = vst.msk [vmem:[%s5313_s17] sm:$0xff] %vm1509_vm2, %v1834_v11  ;;  %v1824_v55 = vadd.f32 %v5108_v45, %v1758_v62  ;;  %v3059_v45 = vpop.xlane.xlu1 %3058 }
 0x97c   : > { %4318 = vrcp.f32 %v3059_v45 }
 0x97d   : > { %v1836_v60 = vadd.f32 %v1832_v46, %v1824_v55 }
 0x97e   : > { %v2751_v10 = vpop.permute.xlu0 %2750 }
 0x97f   : > { %1840 = vst.msk [vmem:[%s5313_s17 + $0x20] sm:$0xff] %vm1509_vm2, %v1836_v60  ;;  %v3062_v14 = vpop.xlane.xlu1 %3061 }
 0x980   : > { %4320 = vrcp.f32 %v3062_v14  ;;  %v1833_v14 = vld [vmem:[%s4497_s20 + $0x30] sm:$0xff] }
 0x982   : > { %v2761_v36 = vpop.permute.xlu0 %2760 }
 0x983   : > { %v3065_v9 = vpop.xlane.xlu1 %3064 }
 0x984   : > { %4322 = vrcp.f32 %v3065_v9 }
 0x987   : > { %v3068_v17 = vpop.xlane.xlu1 %3067 }
 0x988   : > { %4324 = vrcp.f32 %v3068_v17 }
 0x989   : > { %v4319_v7 = vpop.eup %4318 }
 0x98b   : > { %v3071_v18 = vpop.xlane.xlu1 %3070 }
 0x98c   : > { %4326 = vrcp.f32 %v3071_v18 }
 0x98d   : > { %v4321_v26 = vpop.eup %4320 }
 0x98f   : > { %v3074_v41 = vpop.xlane.xlu1 %3073 }
 0x990   : > { %4328 = vrcp.f32 %v3074_v41 }
 0x991   : > { %v4323_v37 = vpop.eup %4322 }
 0x993   : > { %v3077_v39 = vpop.xlane.xlu1 %3076 }
 0x994   : > { %4330 = vrcp.f32 %v3077_v39 }
 0x995   : > { %v4325_v28 = vpop.eup %4324 }
 0x999   : > { %v4327_v40 = vpop.eup %4326 }
 0x9cf   : > { %v2332_v3 = vpop.permute.xlu0 %2331 }
 0x9d0   : > { %v2343_v8 = vadd.f32 %v2332_v3, %v1830_v1  ;;  %v4329_v1 = vpop.eup %4328  ;;  %v4195_v3 = vld [vmem:[%s5453_s6 + $0x8] sm:$0xff]  }
 0x9d1   : > { %v4331_v21 = vpop.eup %4330 }
 0x9d2   : > { %2348 = vst.msk [vmem:[%s5313_s17] sm:$0xff] %vm2347_vm3, %v2343_v8  ;;  %v1831_v8 = vld [vmem:[%s4497_s20 + $0x10] sm:$0xff] }
 0x9d3   : > { %v2336_v24 = vpop.permute.xlu0 %2335 }
 0x9d4   : > { %v2345_v30 = vadd.f32 %v2336_v24, %v1832_v46 }
 0x9d6   : > { %2350 = vst.msk [vmem:[%s5313_s17 + $0x20] sm:$0xff] %vm2347_vm3, %v2345_v30  ;;  %v2320_v30 = vadd.f32 %v5244_v58, %v5297_v12  ;;  %v2836_v12 = vld [vmem:[%s4497_s20 + $0x38] sm:$0xff] }
 0x9ed   : > { %v3942_v19 = vpop.f32.mrf.mxu0 }
 0x9ee   : > { %v2827_v52 = vadd.f32 %v3942_v19, %v2761_v36 }
 0x9ef   : > { %v2818_v2 = vpop.f32.mrf.mxu0 }
 0x9f0   : > { %v2839_v4 = vadd.f32 %v5325_v48, %v2827_v52  ;;  %v2819_v32 = vadd.f32 %v2818_v2, %v2751_v10  ;;  %v2834_v2 = vld [vmem:[%s4497_s20 + $0x18] sm:$0xff]  ;;  %s3743_s20 = sshll.u32 %s4465_s30, 10  ;;  %s5407_s30 = scalar_lea.sflag [#allocation6], %s296_s12 }
 0x9f1   : > { %v5336_v57 = vpop.f32.mrf.mxu0  ;;  %s5399_s26 = scalar_lea.hbm %s5455_s8, %s3743_s20 }
 0x9f2   : > { %2843 = vst.msk [vmem:[%s5313_s17 + $0x28] sm:$0xff] %vm1509_vm2, %v2839_v4  ;;  %v2837_v56 = vadd.f32 %v5328_v6, %v2819_v32 }
 0x9f3   : > { %v5338_v51 = vpop.f32.mrf.mxu0 }
 0x9f4   : > { %2841 = vst.msk [vmem:[%s5313_s17 + $0x8] sm:$0xff] %vm1509_vm2, %v2837_v56 }
 0x9fd   : > { %v3970_v16 = vpop.f32.mrf.mxu0 }
 0x9fe   : > { %v3188_v61 = vmul.f32 %v4321_v26, %v3970_v16 }
 0x9ff   : > { %v3152_v31 = vpop.f32.mrf.mxu0 }
 0xa00   : > { %v3184_v22 = vmul.f32 %v4317_v23, %v3152_v31 }
 0xa01   : > { %v3971_v29 = vpop.f32.mrf.mxu0 }
 0xa02   : > { %3199 = vxpose.xlu1.b32.start [1/8] (short) (narrow) %v3184_v22, 32  ;;  %v3190_v63 = vmul.f32 %v4323_v37, %v3971_v29 }
 0xa03   : > { %v3155_v59 = vpop.f32.mrf.mxu0 }
 0xa04   : > { %v3186_v25 = vmul.f32 %v4319_v7, %v3155_v59 }
 0xa05   : > { %v3974_v0 = vpop.f32.mrf.mxu0 }
 0xa06   : > { %3200 = vxpose.xlu1.b32.cont [2/8] (short) (narrow) %v3186_v25, 32  ;;  %v3196_v33 = vmul.f32 %v4329_v1, %v3974_v0 }
 0xa07   : > { %v3168_v49 = vpop.f32.mrf.mxu0 }
 0xa08   : > { %v3192_v34 = vmul.f32 %v4325_v28, %v3168_v49 }
 0xa09   : > { %v3975_v44 = vpop.f32.mrf.mxu0 }
 0xa0a   : > { %3201 = vxpose.xlu1.b32.cont [3/8] (short) (narrow) %v3188_v61, 32  ;;  %v3198_v11 = vmul.f32 %v4331_v21, %v3975_v44 }
 0xa0b   : > { %v3171_v15 = vpop.f32.mrf.mxu0 }
 0xa0c   : > { %v3194_v13 = vmul.f32 %v4327_v40, %v3171_v15 }
 0xa0e   : > { %3202 = vxpose.xlu1.b32.cont [4/8] (short) (narrow) %v3190_v63, 32 }
 0xa12   : > { %3203 = vxpose.xlu1.b32.cont [5/8] (short) (narrow) %v3192_v34, 32 }
 0xa16   : > { %3204 = vxpose.xlu1.b32.cont [6/8] (short) (narrow) %v3194_v13, 32 }
 0xa1a   : > { %3205 = vxpose.xlu1.b32.cont [7/8] (short) (narrow) %v3196_v33, 32 }
 0xa1e   : > { %3206 = vxpose.xlu1.b32.end [8/8] (short) (narrow) %v3198_v11, 32 }
 0xa3c   : > { %2245 = vperm.xlu1 %4045, %v5273_v35  }
 0xa40   : > { %1752 = vperm.xlu1 %4045, %v5273_v35  }
 0xa44   : > { %1762 = vperm.xlu1 %4045, %v5267_v47  }
 0xa48   : > { %2755 = vperm.xlu1 %4045, %v5273_v35  }
 0xa4c   : > { %2765 = vperm.xlu1 %4045, %v5267_v47  }
 0xa7e   : > { %v3215_v46 = vpop.trf.xlu1 }
 0xa82   : > { %v3216_v62 = vpop.trf.xlu1 }
 0xa83   : > { %v3231_v36 = vpack.c.bf16 %v3216_v62, %v3215_v46 }
 0xa86   : > { %v3217_v55 = vpop.trf.xlu1 }
 0xa8a   : > { %v3218_v60 = vpop.trf.xlu1 }
 0xa8b   : > { %v3232_v10 = vpack.c.bf16 %v3218_v60, %v3217_v55 }
 0xa8d   : > { %3976 = vmatprep.subr.bf16.mxu0 %v3232_v10 }
 0xa8e   : > { %3977 = vmatpush3.bf16.msra.mxu0 %v3232_v10 }
 0xa8f   : > { %3978 = vmatprep.subr.bf16.mxu0 %v3231_v36 }
 0xa92   : > { %3979 = vmatpush3.bf16.msra.mxu0 %v3231_v36 }
 0xa95   : > { %3981 = vmatmul.mubr.msk.bf16.vlgmr.msra.gmra.mxu0 %vm563_vm0, %v4195_v3 }
 0xab7   : > { %v2246_v47 = vpop.permute.xlu1 %2245 }
 0xab8   : > { %v2312_v35 = vadd.f32 %v5247_v54, %v2246_v47 }
 0xaba   : > { %2333 = vrot.lane.b32.xlu1 %v2312_v35, %s4395_s11 }
 0xabb   : > { %v1753_v24 = vpop.permute.xlu1 %1752 }
 0xabc   : > { %v1819_v50 = vadd.f32 %v5120_v42, %v1753_v24 }
 0xabe   : > { %v1835_v45 = vadd.f32 %v1831_v8, %v1819_v50  ;;  %2337 = vrot.lane.b32.xlu1 %v2320_v30, %s4395_s11 }
 0xabf   : > { %v1763_v19 = vpop.permute.xlu1 %1762 }
 0xac0   : > { %1839 = vst.msk [vmem:[%s5313_s17 + $0x10] sm:$0xff] %vm1509_vm2, %v1835_v45  ;;  %v1827_v54 = vadd.f32 %v5116_v38, %v1763_v19 }
 0xac2   : > { %v1837_v52 = vadd.f32 %v1833_v14, %v1827_v54 }
 0xac3   : > { %v2756_v4 = vpop.permute.xlu1 %2755 }
 0xac4   : > { %1841 = vst.msk [vmem:[%s5313_s17 + $0x30] sm:$0xff] %vm1509_vm2, %v1837_v52  ;;  %v2822_v58 = vadd.f32 %v5338_v51, %v2756_v4 }
 0xac6   : > { %v2838_v42 = vadd.f32 %v2834_v2, %v2822_v58 }
 0xac7   : > { %v2766_v32 = vpop.permute.xlu1 %2765 }
 0xac8   : > { %2842 = vst.msk [vmem:[%s5313_s17 + $0x18] sm:$0xff] %vm1509_vm2, %v2838_v42  ;;  %v2830_v56 = vadd.f32 %v5336_v57, %v2766_v32 }
 0xaca   : > { %v2840_v9 = vadd.f32 %v2836_v12, %v2830_v56 }
 0xacc   : > { %2844 = vst.msk [vmem:[%s5313_s17 + $0x38] sm:$0xff] %vm1509_vm2, %v2840_v9 }
 0xb2c   : > { %v2334_v17 = vpop.permute.xlu1 %2333 }
 0xb2d   : > { %v2344_v38 = vadd.f32 %v2334_v17, %v1831_v8 }
 0xb2f   : > { %2349 = vst.msk [vmem:[%s5313_s17 + $0x10] sm:$0xff] %vm2347_vm3, %v2344_v38 }
 0xb30   : > { %v2338_v16 = vpop.permute.xlu1 %2337 }
 0xb31   : > { %v2346_v23 = vadd.f32 %v2338_v16, %v1833_v14 }
 0xb33   : > { %2351 = vst.msk [vmem:[%s5313_s17 + $0x30] sm:$0xff] %vm2347_vm3, %v2346_v23 }
 0xb55   : > { %v3982_v51 = vpop.f32.mrf.mxu0 }
 0xb56   : > { %v3320_v29 = vadd.f32 %v3982_v51, %v5303_v43 }
 0xb57   : > { %v3311_v18 = vpop.f32.mrf.mxu0 }
 0xb58   : > { %v3312_v31 = vadd.f32 %v3311_v18, %v5299_v5 }
 0xb59   : > { %v3983_v22 = vpop.f32.mrf.mxu0 }
 0xb5a   : > { %3334 = vrot.lane.b32.xlu0 %v3312_v31, %s4395_s11  ;;  %v3323_v59 = vadd.f32 %v3983_v22, %v5305_v53 }
 0xb5b   : > { %v3314_v57 = vpop.f32.mrf.mxu0 }
 0xb5c   : > { %v3315_v7 = vadd.f32 %v3314_v57, %v5301_v20 }
 0xb5e   : > { %3336 = vrot.lane.b32.xlu1 %v3315_v7, %s4395_s11  ;;  %3338 = vrot.lane.b32.xlu0 %v3320_v29, %s4395_s11 }
 0xb62   : > { %3340 = vrot.lane.b32.xlu1 %v3323_v59, %s4395_s11  ;;  %s4396_s11 = smov [#allocation5]  }
 0xb63   : > { %s4336_s16 = sshll.u32 %s4396_s11, 4  ;;  %s4337_s16 = int_to_ptr.vmem [resolvable:$false] %s4336_s16 }
 0xb64   : > { %s4338_s18 = scalar_lea.vmem %s4337_s16, 2048  ;;  %p4339_p0 = scmp.lt.s32.totalorder %s5401_s23, %s4337_s16 }
 0xb65   : > { %p4340_p1 = scmp.lt.s32.totalorder %s4338_s18, %s4332_s9 }
 0xb67   : > { %p4341_p2 = por %p4340_p1, %p4339_p0 }
 0xb69   : > { %p4342_p3 = pnand %p4341_p2, %p4335_p13 }
 0xbcc   : > { %v3335_v5 = vpop.permute.xlu0 %3334 }
 0xbcd   : > { %v3346_v25 = vadd.f32 %v3335_v5, %v5328_v6 }
 0xbcf   : > { %3350 = vst.msk [vmem:[%s5313_s17 + $0x8] sm:$0xff] %vm2347_vm3, %v3346_v25 }
 0xbd0   : > { %v3337_v41 = vpop.permute.xlu1 %3336  ;;  %v3339_v43 = vpop.permute.xlu0 %3338 }
 0xbd1   : > { %v3347_v0 = vadd.f32 %v3337_v41, %v2834_v2  ;;  %v3348_v20 = vadd.f32 %v3339_v43, %v5325_v48 }
 0xbd3   : > { %3351 = vst.msk [vmem:[%s5313_s17 + $0x18] sm:$0xff] %vm2347_vm3, %v3347_v0  ;;  %3352 = vst.msk [vmem:[%s5313_s17 + $0x28] sm:$0xff] %vm2347_vm3, %v3348_v20 }
 0xbd4   : > { %v3341_v53 = vpop.permute.xlu1 %3340 }
 0xbd5   : > { %v3349_v6 = vadd.f32 %v3341_v53, %v2836_v12 }
 0xbd7   : > { %3353 = vst.msk [vmem:[%s5313_s17 + $0x38] sm:$0xff] %vm2347_vm3, %v3349_v6 }
 0xbd8   : > { %4345 = shalt.err (!%p4342_p3)
}
 0xbd9   : > { %s4346_s12 = scalar_lea.hbm %s5399_s26, 1024  ;;  %s4350_s21 = scalar_lea.hbm %s5455_s8, 2048 }
 0xbda   : > { %p4347_p4 = scmp.ne.s32.totalorder %s5399_s26, %s4346_s12  ;;  %p4351_p9 = scmp.lt.s32.totalorder %s5399_s26, %s5455_s8 }
 0xbdb   : > { %p4352_p10 = scmp.lt.s32.totalorder %s4350_s21, %s4346_s12 }
 0xbdc   : > { %p4348_p7 = pnand %p4347_p4, %p4482_p5 }
 0xbdd   : > { %p4353_p11 = por %p4352_p10, %p4351_p9 }
 0xbde   : > { %p4349_p8 = pneg %p4348_p7 }
 0xbe0   : > { %p4354_p12 = pnand %p4353_p11, %p4349_p8 }
 0xbe2   : > { %4357 = shalt.err (!%p4354_p12)
}
 0xbe3   : > { %s4397_s24 = smov 256   ;;  %s4398_s25 = smov 16  }
 0xbe4   : > { %4000 = dma.vmem_to_hbm [thread:$0]  (%p4482_p5), %s5401_s23, 1024, %s5399_s26, %s5407_s30, %s4397_s24, %s4397_s24, %s4398_s25  }
 0xbe5 PF: > { %p4006_p13 = scmp.ge.s32.totalorder %s4392_s29, 2  ;;  %s3383_s9 = sand.u32 1, %s4380_s27  }
 0xbe6   : > { %s3384_s11 = scalar_lea.sflag [#allocation6], %s3383_s9 }
 0xbe7   : > { %p4003_p0 = pnand %p4006_p13, %p4486_p6 }
 0xbe9   : > { %p4004_p1 = pneg %p4003_p0 }
 0xbeb   : > { %4375 = dma.done.wait (%p4004_p1), %s3384_s11, 1024  }
 0xbec   : > { %4377 = vsyncadd (%p4004_p1), %s3384_s11, 4294966272  ;;  %p18_p2 = scmp.ge.s32.totalorder %s4469_s10, 4   ;;  %s5458_s27 = smov %s4384_s3 }
 0xbed   : > { %s5459_s3 = smov %s4388_s28  ;;  %s5460_s28 = smov %s4480_s13 }
 0xbee   : > { %s5461_s29 = smov %s4469_s10  ;;  %20 = sbr.rel (!%p18_p2) target bundleno = 3 (0x3), region = 87 }
 0xbf3   :  { %3389 = vsyncpa [#allocation6], 1 }
 0xbf4   :  { %3391 = vsyncpa [#allocation6 + $0x1], 1 }

</bundles_post_ra>
